<compile_context>
chip_gen: v7x
topology: tpu7x:2x2x1
jax: 0.10.0
libtpu: 0.0.40
codegen_flags: <defaults>
</compile_context>

<pallas_src>
import functools

import jax
import jax.numpy as jnp
from jax.experimental import pallas as pl
from jax.experimental.pallas import tpu as pltpu

_COMPUTE_DTYPE = jnp.bfloat16   # MXU input dtype for the big matmuls (f32 accumulation)
_HPAD = 128                     # padded width of the 64-wide hidden layers


def _round_up(n, m):
    return (n + m - 1) // m * m


def _bias_layout(input_dim, latent_dim):
    """Lane layout of the single packed f32 bias array.

    Widths: b1, b2, b3(pad), head(pad), db1(pad), db2, db3, db4.
    All offsets are multiples of 128 (head_pad is a multiple of 128), so the
    in-kernel static lane slices are tile-aligned."""
    head_pad = max(128, _round_up(2 * latent_dim, 128))
    widths = (256, 128, _HPAD, head_pad, _HPAD, 128, 256, input_dim)
    slices, off = [], 0
    for w in widths:
        slices.append((off, w))
        off += w
    return head_pad, tuple(slices), off


def vae_forward_kernel(
    x_ref, eps_ref,
    # weights: encoder L1-L3, fused head (f32), decoder L1-L4
    w1_ref, w2_ref, w3_ref, wh_ref, dw1_ref, dw2_ref, dw3_ref, dw4_ref,
    # single packed f32 bias array (lane-aligned slices)
    bias_ref,
    # outputs
    recon_ref, mu_ref, logvar_ref,
    *, latent_dim, bias_slices,
):
    def bias(i):
        s, n = bias_slices[i]
        return bias_ref[:, s:s + n]

    def dense(a, w_ref, i):
        # bf16 MXU inputs, f32 accumulation; bias add stays f32.
        return jnp.dot(a.astype(_COMPUTE_DTYPE), w_ref[...],
                       preferred_element_type=jnp.float32) + bias(i)

    def relu(a):
        return jnp.maximum(a, 0.0)

    x = x_ref[...]                                   # (tb, input_dim) f32

    # ----- encoder -----
    h = relu(dense(x, w1_ref, 0))                    # (tb, 256)
    h = relu(dense(h, w2_ref, 1))                    # (tb, 128)
    h = relu(dense(h, w3_ref, 2))                    # (tb, 128), cols [64:128] exactly 0

    # ----- fused latent head [mu | logvar | 0...], kept in f32 (tiny matmul) -----
    head = jnp.dot(h, wh_ref[...], preferred_element_type=jnp.float32) + bias(3)
    mu = head[:, :latent_dim]
    logvar = head[:, latent_dim:2 * latent_dim]

    # ----- reparameterization: z = mu + eps * exp(0.5 * logvar) (all f32) -----
    z = mu + eps_ref[...] * jnp.exp(0.5 * logvar)    # (tb, latent)

    # ----- decoder -----
    d = relu(dense(z, dw1_ref, 4))                   # (tb, 128), cols [64:128] exactly 0
    d = relu(dense(d, dw2_ref, 5))                   # (tb, 128)
    d = relu(dense(d, dw3_ref, 6))                   # (tb, 256)
    recon = dense(d, dw4_ref, 7)                     # (tb, input_dim)

    recon_ref[...] = recon.astype(recon_ref.dtype)
    mu_ref[...] = mu.astype(mu_ref.dtype)
    logvar_ref[...] = logvar.astype(logvar_ref.dtype)


def _device_hints():
    """Best-effort (VMEM-tile-budget, tensorcore-count) probe; conservative fallback."""
    budget = 12 << 20          # fits under v5e's 16 MiB scoped-VMEM default (+ ~1 MiB weights)
    num_cores = 1
    try:
        d = jax.devices()[0]
        if d.platform == "tpu":
            kind = str(getattr(d, "device_kind", "")).lower()
            if not ("v5 lite" in kind or "v5lite" in kind or "v5e" in kind):
                budget = 20 << 20      # v4/v6e/v7x scoped-VMEM defaults are >= 32 MiB
            nc = getattr(d, "num_cores", 1)
            if ("v7" in kind) or ("v4" in kind) or (isinstance(nc, int) and nc >= 2):
                num_cores = 2          # megacore / dual-TC: want an even step count
    except Exception:
        pass
    return budget, num_cores


def _pick_tb(batch, per_row_bytes, num_cores, vmem_budget_bytes):
    """Largest multiple-of-8 divisor of `batch` (<=2048) fitting the VMEM budget,
    preferring a step count divisible by num_cores so dual-TC chips stay balanced."""
    max_tb = min(2048, max(8, vmem_budget_bytes // max(1, per_row_bytes)))
    divisors = [t for t in range(8, batch + 1, 8) if batch % t == 0]
    if not divisors:
        return batch                      # odd batch: single full-array tile
    fitting = [t for t in divisors if t <= max_tb] or [min(divisors)]
    balanced = [t for t in fitting if (batch // t) % num_cores == 0]
    return max(balanced) if balanced else max(fitting)


def prepare_params(params, latent_dim, *, compute_dtype=_COMPUTE_DTYPE):
    """Fuse + pad the raw f32 parameters for the kernel.

    params: flat tuple (W1,b1,W2,b2,W3,b3,Wmu,bmu,Wlv,blv,DW1,Db1,DW2,Db2,DW3,Db3,DW4,Db4)
            with W stored as (in, out) and b as (1, out), all f32.
    Returns (W1,W2,W3p,WHp,DW1p,DW2p,DW3,DW4, bias_packed):
      weights in `compute_dtype` except the fused head WHp (f32); one packed f32 bias row.
    """
    (w1, b1, w2, b2, w3, b3, wmu, bmu, wlv, blv,
     dw1, db1, dw2, db2, dw3, db3, dw4, db4) = params
    input_dim = w1.shape[0]
    head_pad, _, bias_total = _bias_layout(input_dim, latent_dim)

    def pad_cols(a, to):
        return jnp.pad(a, ((0, 0), (0, to - a.shape[1])))

    def pad_rows(a, to):
        return jnp.pad(a, ((0, to - a.shape[0]), (0, 0)))

    # encoder L3 (128 -> 64): pad output to 128; zero bias + ReLU => padded cols are 0.
    w3p, b3p = pad_cols(w3, _HPAD), pad_cols(b3, _HPAD)
    # fused heads (64 -> 2*latent): pad contraction to 128 (padded h cols are 0) and pad
    # output to a lane-dense multiple of 128.  Kept in f32 (logvar feeds exp()).
    wh = pad_cols(pad_rows(jnp.concatenate([wmu, wlv], axis=1), _HPAD), head_pad)
    bh = pad_cols(jnp.concatenate([bmu, blv], axis=1), head_pad)
    # decoder L1 (latent -> 64): pad output to 128.
    dw1p, db1p = pad_cols(dw1, _HPAD), pad_cols(db1, _HPAD)
    # decoder L2 (64 -> 128): pad contraction to 128 to match padded d1.
    dw2p = pad_rows(dw2, _HPAD)

    bias_packed = jnp.concatenate(
        [b1, b2, b3p, bh, db1p, db2, db3, db4], axis=1).astype(jnp.float32)
    assert bias_packed.shape == (1, bias_total)

    weights = (
        w1.astype(compute_dtype), w2.astype(compute_dtype), w3p.astype(compute_dtype),
        wh.astype(jnp.float32),
        dw1p.astype(compute_dtype), dw2p.astype(compute_dtype),
        dw3.astype(compute_dtype), dw4.astype(compute_dtype),
    )
    return weights + (bias_packed,)


def weighted_autoencoder_forward(x, eps, prepared_params, *, latent_dim, tb=None):
    """Run the VAE forward pass as a single Pallas kernel, tiled over the batch.

    prepared_params: output of prepare_params.
    Returns (recon, mu, logvar) -- all emitted directly by the kernel (no wrapper slicing).
    """
    B, input_dim = x.shape
    assert eps.shape == (B, latent_dim)
    head_pad, bias_slices, bias_total = _bias_layout(input_dim, latent_dim)
    assert prepared_params[3].shape == (_HPAD, head_pad)
    assert prepared_params[8].shape == (1, bias_total)

    if tb is None:
        vmem_budget, num_cores = _device_hints()
        # Per-row VMEM estimate: double-buffered I/O tiles + live f32 activation temporaries.
        io_per_row = 2 * 4 * (2 * input_dim + 3 * latent_dim)
        act_per_row = 4 * (256 + 128 + 128 + head_pad + latent_dim
                           + 128 + 128 + 256 + input_dim)
        tb = _pick_tb(B, io_per_row + act_per_row, num_cores, vmem_budget)
    assert B % tb == 0, "batch must be divisible by the batch tile"
    assert tb == B or tb % 8 == 0, "batch tile must be a multiple of 8 (f32 sublane)"
    grid = (B // tb,)

    def row_spec(cols):
        return pl.BlockSpec((tb, cols), lambda i: (i, 0))

    def full_spec(shape):
        # Weights/biases are fully resident; constant index map => no re-DMA across steps.
        return pl.BlockSpec(shape, lambda i: (0, 0))

    in_specs = [row_spec(input_dim), row_spec(latent_dim)]
    in_specs += [full_spec(p.shape) for p in prepared_params]

    out_shape = (
        jax.ShapeDtypeStruct((B, input_dim), jnp.float32),    # recon (lane-dense)
        jax.ShapeDtypeStruct((B, latent_dim), jnp.float32),   # mu
        jax.ShapeDtypeStruct((B, latent_dim), jnp.float32),   # logvar
    )
    out_specs = (row_spec(input_dim), row_spec(latent_dim), row_spec(latent_dim))

    # Advisory cost estimate so XLA schedules neighbors around the custom call.
    flops = 2 * B * (input_dim * 256 + 256 * 128 + 128 * 64 + 64 * 2 * latent_dim
                     + latent_dim * 64 + 64 * 128 + 128 * 256 + 256 * input_dim)
    param_bytes = sum(int(p.size) * p.dtype.itemsize for p in prepared_params)
    bytes_accessed = B * 4 * (2 * input_dim + 3 * latent_dim) + param_bytes
    cost = pl.CostEstimate(flops=flops, transcendentals=B * latent_dim,
                           bytes_accessed=bytes_accessed)

    fn = pl.pallas_call(
        functools.partial(vae_forward_kernel,
                          latent_dim=latent_dim, bias_slices=bias_slices),
        out_shape=out_shape,
        grid_spec=pltpu.PrefetchScalarGridSpec(
            num_scalar_prefetch=0,
            grid=grid,
            in_specs=in_specs,
            out_specs=out_specs,
        ),
        compiler_params=pltpu.CompilerParams(
            dimension_semantics=("parallel",),
        ),
        cost_estimate=cost,
    )
    recon, mu, logvar = fn(x, eps, *prepared_params)
    return recon, mu, logvar


def init_params(key, input_dim, latent_dim):
    """Deterministic PyTorch-style nn.Linear init: U(-1/sqrt(fan_in), 1/sqrt(fan_in)).

    Weights are returned as (in, out) (transposed vs. torch) and biases as (1, out), f32.
    """
    layer_dims = [
        (input_dim, 256), (256, 128), (128, 64),                    # encoder
        (64, latent_dim), (64, latent_dim),                         # fc_mu, fc_logvar
        (latent_dim, 64), (64, 128), (128, 256), (256, input_dim),  # decoder
    ]
    params = []
    for i, (fan_in, fan_out) in enumerate(layer_dims):
        kw, kb = jax.random.split(jax.random.fold_in(key, i))
        bound = 1.0 / jnp.sqrt(jnp.float32(fan_in))
        w = jax.random.uniform(kw, (fan_in, fan_out), jnp.float32, -bound, bound)
        b = jax.random.uniform(kb, (1, fan_out), jnp.float32, -bound, bound)
        params += [w, b]
    return tuple(params)


def reference_forward_f32(x, eps, params):
    """Pure-JAX f32 reference of the original module semantics (unfused, unpadded)."""
    (w1, b1, w2, b2, w3, b3, wmu, bmu, wlv, blv,
     dw1, db1, dw2, db2, dw3, db3, dw4, db4) = params
    h = jnp.maximum(x @ w1 + b1, 0.0)
    h = jnp.maximum(h @ w2 + b2, 0.0)
    h = jnp.maximum(h @ w3 + b3, 0.0)
    mu = h @ wmu + bmu
    logvar = h @ wlv + blv
    z = mu + eps * jnp.exp(0.5 * logvar)
    d = jnp.maximum(z @ dw1 + db1, 0.0)
    d = jnp.maximum(d @ dw2 + db2, 0.0)
    d = jnp.maximum(d @ dw3 + db3, 0.0)
    recon = d @ dw4 + db4
    return recon, mu, logvar


def reference_forward_mixed(x, eps, params):
    """Pure-JAX reference with the SAME cast points as the kernel:
    bf16 weights/inputs with f32 accumulation on the big layers, f32 latent head."""
    (w1, b1, w2, b2, w3, b3, wmu, bmu, wlv, blv,
     dw1, db1, dw2, db2, dw3, db3, dw4, db4) = params

    def dense(a, w, b):
        return jnp.dot(a.astype(_COMPUTE_DTYPE), w.astype(_COMPUTE_DTYPE),
                       preferred_element_type=jnp.float32) + b

    h = jnp.maximum(dense(x, w1, b1), 0.0)
    h = jnp.maximum(dense(h, w2, b2), 0.0)
    h = jnp.maximum(dense(h, w3, b3), 0.0)
    mu = jnp.dot(h, wmu, preferred_element_type=jnp.float32) + bmu
    logvar = jnp.dot(h, wlv, preferred_element_type=jnp.float32) + blv
    z = mu + eps * jnp.exp(0.5 * logvar)
    d = jnp.maximum(dense(z, dw1, db1), 0.0)
    d = jnp.maximum(dense(d, dw2, db2), 0.0)
    d = jnp.maximum(dense(d, dw3, db3), 0.0)
    recon = dense(d, dw4, db4)
    return recon, mu, logvar


if __name__ == "__main__":
    key = jax.random.PRNGKey(0)
    batch, input_dim, latent_dim = 128, 256, 32

    k_x, k_eps, k_p = jax.random.split(key, 3)
    x = jax.random.normal(k_x, (batch, input_dim), jnp.float32)
    # eps is the N(0,1) sample from torch.randn_like(std); generated deterministically here.
    eps = jax.random.normal(k_eps, (batch, latent_dim), jnp.float32)
    raw_params = init_params(k_p, input_dim, latent_dim)
    prepared = prepare_params(raw_params, latent_dim)

    recon, mu, logvar = weighted_autoencoder_forward(
        x, eps, prepared, latent_dim=latent_dim)
    jax.block_until_ready((recon, mu, logvar))

    assert recon.shape == (batch, input_dim)
    assert mu.shape == (batch, latent_dim) and logvar.shape == (batch, latent_dim)

    # Tight check vs. a pure-JAX reference using the SAME mixed-precision cast points
    # (confirms the fusion/padding/packing did not change the math).
    r_m, mu_m, lv_m = reference_forward_mixed(x, eps, raw_params)
    assert jnp.allclose(recon, r_m, atol=2e-3, rtol=2e-3)
    assert jnp.allclose(mu, mu_m, atol=2e-3, rtol=2e-3)
    assert jnp.allclose(logvar, lv_m, atol=2e-3, rtol=2e-3)

    # Loose check vs. the original f32 semantics (differences = bf16 matmul rounding only).
    r_f, mu_f, lv_f = reference_forward_f32(x, eps, raw_params)
    assert jnp.allclose(recon, r_f, atol=5e-2, rtol=5e-2)
    assert jnp.allclose(mu, mu_f, atol=5e-2, rtol=5e-2)
    assert jnp.allclose(logvar, lv_f, atol=5e-2, rtol=5e-2)

    print("KERNEL_OK")
</pallas_src>

<mosaic_0001>
module attributes {stable_mosaic.version = 11 : i64} {
  func.func @vae_forward_kernel(%arg0: i32, %arg1: memref<128x256xf32, #tpu.memory_space<vmem>>, %arg2: memref<128x32xf32, #tpu.memory_space<vmem>>, %arg3: memref<256x256xbf16, #tpu.memory_space<vmem>>, %arg4: memref<256x128xbf16, #tpu.memory_space<vmem>>, %arg5: memref<128x128xbf16, #tpu.memory_space<vmem>>, %arg6: memref<128x128xf32, #tpu.memory_space<vmem>>, %arg7: memref<32x128xbf16, #tpu.memory_space<vmem>>, %arg8: memref<128x128xbf16, #tpu.memory_space<vmem>>, %arg9: memref<128x256xbf16, #tpu.memory_space<vmem>>, %arg10: memref<256x256xbf16, #tpu.memory_space<vmem>>, %arg11: memref<1x1408xf32, #tpu.memory_space<vmem>>, %arg12: memref<128x256xf32, #tpu.memory_space<vmem>>, %arg13: memref<128x32xf32, #tpu.memory_space<vmem>>, %arg14: memref<128x32xf32, #tpu.memory_space<vmem>>) attributes {dimension_semantics = [#tpu.dimension_semantics<parallel>], iteration_bounds = array<i64: 1>, scalar_prefetch = 0 : i64, scratch_operands = 0 : i64, tpu.core_type = #tpu.core_type<tc>, window_params = [{transform_indices = @transform_0, window_bounds = array<i64: 128, 256>}, {transform_indices = @transform_1, window_bounds = array<i64: 128, 32>}, {pipeline_mode = #tpu.pipeline_mode<synchronous>, transform_indices = @transform_2, window_bounds = array<i64: 256, 256>}, {pipeline_mode = #tpu.pipeline_mode<synchronous>, transform_indices = @transform_3, window_bounds = array<i64: 256, 128>}, {pipeline_mode = #tpu.pipeline_mode<synchronous>, transform_indices = @transform_4, window_bounds = array<i64: 128, 128>}, {pipeline_mode = #tpu.pipeline_mode<synchronous>, transform_indices = @transform_5, window_bounds = array<i64: 128, 128>}, {pipeline_mode = #tpu.pipeline_mode<synchronous>, transform_indices = @transform_6, window_bounds = array<i64: 32, 128>}, {pipeline_mode = #tpu.pipeline_mode<synchronous>, transform_indices = @transform_7, window_bounds = array<i64: 128, 128>}, {pipeline_mode = #tpu.pipeline_mode<synchronous>, transform_indices = @transform_8, window_bounds = array<i64: 128, 256>}, {pipeline_mode = #tpu.pipeline_mode<synchronous>, transform_indices = @transform_9, window_bounds = array<i64: 256, 256>}, {pipeline_mode = #tpu.pipeline_mode<synchronous>, transform_indices = @transform_10, window_bounds = array<i64: 1, 1408>}, {transform_indices = @transform_11, window_bounds = array<i64: 128, 256>}, {transform_indices = @transform_12, window_bounds = array<i64: 128, 32>}, {transform_indices = @transform_13, window_bounds = array<i64: 128, 32>}]} {
    %c0 = arith.constant 0 : index
    %c0_0 = arith.constant 0 : index
    %0 = vector.load %arg1[%c0, %c0_0] : memref<128x256xf32, #tpu.memory_space<vmem>>, vector<128x256xf32>
    %1 = arith.truncf %0 : vector<128x256xf32> to vector<128x256xbf16>
    %c0_1 = arith.constant 0 : index
    %c0_2 = arith.constant 0 : index
    %2 = vector.load %arg3[%c0_1, %c0_2] : memref<256x256xbf16, #tpu.memory_space<vmem>>, vector<256x256xbf16>
    %cst = arith.constant dense<0.000000e+00> : vector<128x256xf32>
    %3 = tpu.matmul %1, %2, %cst {dimension_numbers = #tpu.dot_dimension_numbers<[1], [0], [0], [1], [0, 0, 1, 1], [], []>} : vector<128x256xbf16>, vector<256x256xbf16>, vector<128x256xf32> -> vector<128x256xf32>
    %c0_3 = arith.constant 0 : index
    %c0_4 = arith.constant 0 : index
    %4 = vector.load %arg11[%c0_3, %c0_4] : memref<1x1408xf32, #tpu.memory_space<vmem>>, vector<1x256xf32>
    %5 = vector.broadcast %4 : vector<1x256xf32> to vector<128x256xf32>
    %6 = arith.addf %3, %5 : vector<128x256xf32>
    %cst_5 = arith.constant 0.000000e+00 : f32
    %7 = vector.broadcast %cst_5 : f32 to vector<128x256xf32>
    %8 = arith.maximumf %6, %7 : vector<128x256xf32>
    %9 = arith.truncf %8 : vector<128x256xf32> to vector<128x256xbf16>
    %c0_6 = arith.constant 0 : index
    %c0_7 = arith.constant 0 : index
    %10 = vector.load %arg4[%c0_6, %c0_7] : memref<256x128xbf16, #tpu.memory_space<vmem>>, vector<256x128xbf16>
    %cst_8 = arith.constant dense<0.000000e+00> : vector<128x128xf32>
    %11 = tpu.matmul %9, %10, %cst_8 {dimension_numbers = #tpu.dot_dimension_numbers<[1], [0], [0], [1], [0, 0, 1, 1], [], []>} : vector<128x256xbf16>, vector<256x128xbf16>, vector<128x128xf32> -> vector<128x128xf32>
    %c0_9 = arith.constant 0 : index
    %c256 = arith.constant 256 : index
    %12 = vector.load %arg11[%c0_9, %c256] : memref<1x1408xf32, #tpu.memory_space<vmem>>, vector<1x128xf32>
    %13 = vector.broadcast %12 : vector<1x128xf32> to vector<128x128xf32>
    %14 = arith.addf %11, %13 : vector<128x128xf32>
    %cst_10 = arith.constant 0.000000e+00 : f32
    %15 = vector.broadcast %cst_10 : f32 to vector<128x128xf32>
    %16 = arith.maximumf %14, %15 : vector<128x128xf32>
    %17 = arith.truncf %16 : vector<128x128xf32> to vector<128x128xbf16>
    %c0_11 = arith.constant 0 : index
    %c0_12 = arith.constant 0 : index
    %18 = vector.load %arg5[%c0_11, %c0_12] : memref<128x128xbf16, #tpu.memory_space<vmem>>, vector<128x128xbf16>
    %cst_13 = arith.constant dense<0.000000e+00> : vector<128x128xf32>
    %19 = tpu.matmul %17, %18, %cst_13 {dimension_numbers = #tpu.dot_dimension_numbers<[1], [0], [0], [1], [0, 0, 1, 1], [], []>} : vector<128x128xbf16>, vector<128x128xbf16>, vector<128x128xf32> -> vector<128x128xf32>
    %c0_14 = arith.constant 0 : index
    %c384 = arith.constant 384 : index
    %20 = vector.load %arg11[%c0_14, %c384] : memref<1x1408xf32, #tpu.memory_space<vmem>>, vector<1x128xf32>
    %21 = vector.broadcast %20 : vector<1x128xf32> to vector<128x128xf32>
    %22 = arith.addf %19, %21 : vector<128x128xf32>
    %cst_15 = arith.constant 0.000000e+00 : f32
    %23 = vector.broadcast %cst_15 : f32 to vector<128x128xf32>
    %24 = arith.maximumf %22, %23 : vector<128x128xf32>
    %c0_16 = arith.constant 0 : index
    %c0_17 = arith.constant 0 : index
    %25 = vector.load %arg6[%c0_16, %c0_17] : memref<128x128xf32, #tpu.memory_space<vmem>>, vector<128x128xf32>
    %cst_18 = arith.constant dense<0.000000e+00> : vector<128x128xf32>
    %26 = tpu.matmul %24, %25, %cst_18 {dimension_numbers = #tpu.dot_dimension_numbers<[1], [0], [0], [1], [0, 0, 1, 1], [], []>} : vector<128x128xf32>, vector<128x128xf32>, vector<128x128xf32> -> vector<128x128xf32>
    %c0_19 = arith.constant 0 : index
    %c512 = arith.constant 512 : index
    %27 = vector.load %arg11[%c0_19, %c512] : memref<1x1408xf32, #tpu.memory_space<vmem>>, vector<1x128xf32>
    %28 = vector.broadcast %27 : vector<1x128xf32> to vector<128x128xf32>
    %29 = arith.addf %26, %28 : vector<128x128xf32>
    %30 = vector.extract_strided_slice %29 {offsets = [0, 0], sizes = [128, 32], strides = [1, 1]} : vector<128x128xf32> to vector<128x32xf32>
    %31 = vector.extract_strided_slice %29 {offsets = [0, 32], sizes = [128, 32], strides = [1, 1]} : vector<128x128xf32> to vector<128x32xf32>
    %c0_20 = arith.constant 0 : index
    %c0_21 = arith.constant 0 : index
    %32 = vector.load %arg2[%c0_20, %c0_21] : memref<128x32xf32, #tpu.memory_space<vmem>>, vector<128x32xf32>
    %cst_22 = arith.constant 5.000000e-01 : f32
    %33 = vector.broadcast %cst_22 : f32 to vector<128x32xf32>
    %34 = arith.mulf %33, %31 : vector<128x32xf32>
    %35 = math.exp %34 : vector<128x32xf32>
    %36 = arith.mulf %32, %35 : vector<128x32xf32>
    %37 = arith.addf %30, %36 : vector<128x32xf32>
    %38 = arith.truncf %37 : vector<128x32xf32> to vector<128x32xbf16>
    %c0_23 = arith.constant 0 : index
    %c0_24 = arith.constant 0 : index
    %39 = vector.load %arg7[%c0_23, %c0_24] : memref<32x128xbf16, #tpu.memory_space<vmem>>, vector<32x128xbf16>
    %cst_25 = arith.constant dense<0.000000e+00> : vector<128x128xf32>
    %40 = tpu.matmul %38, %39, %cst_25 {dimension_numbers = #tpu.dot_dimension_numbers<[1], [0], [0], [1], [0, 0, 1, 1], [], []>} : vector<128x32xbf16>, vector<32x128xbf16>, vector<128x128xf32> -> vector<128x128xf32>
    %c0_26 = arith.constant 0 : index
    %c640 = arith.constant 640 : index
    %41 = vector.load %arg11[%c0_26, %c640] : memref<1x1408xf32, #tpu.memory_space<vmem>>, vector<1x128xf32>
    %42 = vector.broadcast %41 : vector<1x128xf32> to vector<128x128xf32>
    %43 = arith.addf %40, %42 : vector<128x128xf32>
    %cst_27 = arith.constant 0.000000e+00 : f32
    %44 = vector.broadcast %cst_27 : f32 to vector<128x128xf32>
    %45 = arith.maximumf %43, %44 : vector<128x128xf32>
    %46 = arith.truncf %45 : vector<128x128xf32> to vector<128x128xbf16>
    %c0_28 = arith.constant 0 : index
    %c0_29 = arith.constant 0 : index
    %47 = vector.load %arg8[%c0_28, %c0_29] : memref<128x128xbf16, #tpu.memory_space<vmem>>, vector<128x128xbf16>
    %cst_30 = arith.constant dense<0.000000e+00> : vector<128x128xf32>
    %48 = tpu.matmul %46, %47, %cst_30 {dimension_numbers = #tpu.dot_dimension_numbers<[1], [0], [0], [1], [0, 0, 1, 1], [], []>} : vector<128x128xbf16>, vector<128x128xbf16>, vector<128x128xf32> -> vector<128x128xf32>
    %c0_31 = arith.constant 0 : index
    %c768 = arith.constant 768 : index
    %49 = vector.load %arg11[%c0_31, %c768] : memref<1x1408xf32, #tpu.memory_space<vmem>>, vector<1x128xf32>
    %50 = vector.broadcast %49 : vector<1x128xf32> to vector<128x128xf32>
    %51 = arith.addf %48, %50 : vector<128x128xf32>
    %cst_32 = arith.constant 0.000000e+00 : f32
    %52 = vector.broadcast %cst_32 : f32 to vector<128x128xf32>
    %53 = arith.maximumf %51, %52 : vector<128x128xf32>
    %54 = arith.truncf %53 : vector<128x128xf32> to vector<128x128xbf16>
    %c0_33 = arith.constant 0 : index
    %c0_34 = arith.constant 0 : index
    %55 = vector.load %arg9[%c0_33, %c0_34] : memref<128x256xbf16, #tpu.memory_space<vmem>>, vector<128x256xbf16>
    %cst_35 = arith.constant dense<0.000000e+00> : vector<128x256xf32>
    %56 = tpu.matmul %54, %55, %cst_35 {dimension_numbers = #tpu.dot_dimension_numbers<[1], [0], [0], [1], [0, 0, 1, 1], [], []>} : vector<128x128xbf16>, vector<128x256xbf16>, vector<128x256xf32> -> vector<128x256xf32>
    %c0_36 = arith.constant 0 : index
    %c896 = arith.constant 896 : index
    %57 = vector.load %arg11[%c0_36, %c896] : memref<1x1408xf32, #tpu.memory_space<vmem>>, vector<1x256xf32>
    %58 = vector.broadcast %57 : vector<1x256xf32> to vector<128x256xf32>
    %59 = arith.addf %56, %58 : vector<128x256xf32>
    %cst_37 = arith.constant 0.000000e+00 : f32
    %60 = vector.broadcast %cst_37 : f32 to vector<128x256xf32>
    %61 = arith.maximumf %59, %60 : vector<128x256xf32>
    %62 = arith.truncf %61 : vector<128x256xf32> to vector<128x256xbf16>
    %c0_38 = arith.constant 0 : index
    %c0_39 = arith.constant 0 : index
    %63 = vector.load %arg10[%c0_38, %c0_39] : memref<256x256xbf16, #tpu.memory_space<vmem>>, vector<256x256xbf16>
    %cst_40 = arith.constant dense<0.000000e+00> : vector<128x256xf32>
    %64 = tpu.matmul %62, %63, %cst_40 {dimension_numbers = #tpu.dot_dimension_numbers<[1], [0], [0], [1], [0, 0, 1, 1], [], []>} : vector<128x256xbf16>, vector<256x256xbf16>, vector<128x256xf32> -> vector<128x256xf32>
    %c0_41 = arith.constant 0 : index
    %c1152 = arith.constant 1152 : index
    %65 = vector.load %arg11[%c0_41, %c1152] : memref<1x1408xf32, #tpu.memory_space<vmem>>, vector<1x256xf32>
    %66 = vector.broadcast %65 : vector<1x256xf32> to vector<128x256xf32>
    %67 = arith.addf %64, %66 : vector<128x256xf32>
    %c0_42 = arith.constant 0 : index
    %c0_43 = arith.constant 0 : index
    %68 = vector.load %arg12[%c0_42, %c0_43] : memref<128x256xf32, #tpu.memory_space<vmem>>, vector<128x256xf32>
    tpu.vector_store %arg12[%c0_42, %c0_43], %67 {strides = array<i32>} : memref<128x256xf32, #tpu.memory_space<vmem>>, vector<128x256xf32>,
    %c0_44 = arith.constant 0 : index
    %c0_45 = arith.constant 0 : index
    %69 = vector.load %arg13[%c0_44, %c0_45] : memref<128x32xf32, #tpu.memory_space<vmem>>, vector<128x32xf32>
    tpu.vector_store %arg13[%c0_44, %c0_45], %30 {strides = array<i32>} : memref<128x32xf32, #tpu.memory_space<vmem>>, vector<128x32xf32>,
    %c0_46 = arith.constant 0 : index
    %c0_47 = arith.constant 0 : index
    %70 = vector.load %arg14[%c0_46, %c0_47] : memref<128x32xf32, #tpu.memory_space<vmem>>, vector<128x32xf32>
    tpu.vector_store %arg14[%c0_46, %c0_47], %31 {strides = array<i32>} : memref<128x32xf32, #tpu.memory_space<vmem>>, vector<128x32xf32>,
    return
  }
  func.func @transform_0(%arg0: i32) -> (i32, i32) {
    %c0_i32 = arith.constant 0 : i32
    %c0_i32_0 = arith.constant 0 : i32
    return %arg0, %c0_i32 : i32, i32
  }
  func.func @transform_1(%arg0: i32) -> (i32, i32) {
    %c0_i32 = arith.constant 0 : i32
    %c0_i32_0 = arith.constant 0 : i32
    return %arg0, %c0_i32 : i32, i32
  }
  func.func @transform_2(%arg0: i32) -> (i32, i32) {
    %c0_i32 = arith.constant 0 : i32
    %c0_i32_0 = arith.constant 0 : i32
    %c0_i32_1 = arith.constant 0 : i32
    return %c0_i32, %c0_i32_0 : i32, i32
  }
  func.func @transform_3(%arg0: i32) -> (i32, i32) {
    %c0_i32 = arith.constant 0 : i32
    %c0_i32_0 = arith.constant 0 : i32
    %c0_i32_1 = arith.constant 0 : i32
    return %c0_i32, %c0_i32_0 : i32, i32
  }
  func.func @transform_4(%arg0: i32) -> (i32, i32) {
    %c0_i32 = arith.constant 0 : i32
    %c0_i32_0 = arith.constant 0 : i32
    %c0_i32_1 = arith.constant 0 : i32
    return %c0_i32, %c0_i32_0 : i32, i32
  }
  func.func @transform_5(%arg0: i32) -> (i32, i32) {
    %c0_i32 = arith.constant 0 : i32
    %c0_i32_0 = arith.constant 0 : i32
    %c0_i32_1 = arith.constant 0 : i32
    return %c0_i32, %c0_i32_0 : i32, i32
  }
  func.func @transform_6(%arg0: i32) -> (i32, i32) {
    %c0_i32 = arith.constant 0 : i32
    %c0_i32_0 = arith.constant 0 : i32
    %c0_i32_1 = arith.constant 0 : i32
    return %c0_i32, %c0_i32_0 : i32, i32
  }
  func.func @transform_7(%arg0: i32) -> (i32, i32) {
    %c0_i32 = arith.constant 0 : i32
    %c0_i32_0 = arith.constant 0 : i32
    %c0_i32_1 = arith.constant 0 : i32
    return %c0_i32, %c0_i32_0 : i32, i32
  }
  func.func @transform_8(%arg0: i32) -> (i32, i32) {
    %c0_i32 = arith.constant 0 : i32
    %c0_i32_0 = arith.constant 0 : i32
    %c0_i32_1 = arith.constant 0 : i32
    return %c0_i32, %c0_i32_0 : i32, i32
  }
  func.func @transform_9(%arg0: i32) -> (i32, i32) {
    %c0_i32 = arith.constant 0 : i32
    %c0_i32_0 = arith.constant 0 : i32
    %c0_i32_1 = arith.constant 0 : i32
    return %c0_i32, %c0_i32_0 : i32, i32
  }
  func.func @transform_10(%arg0: i32) -> (i32, i32) {
    %c0_i32 = arith.constant 0 : i32
    %c0_i32_0 = arith.constant 0 : i32
    %c0_i32_1 = arith.constant 0 : i32
    return %c0_i32, %c0_i32_0 : i32, i32
  }
  func.func @transform_11(%arg0: i32) -> (i32, i32) {
    %c0_i32 = arith.constant 0 : i32
    %c0_i32_0 = arith.constant 0 : i32
    return %arg0, %c0_i32 : i32, i32
  }
  func.func @transform_12(%arg0: i32) -> (i32, i32) {
    %c0_i32 = arith.constant 0 : i32
    %c0_i32_0 = arith.constant 0 : i32
    return %arg0, %c0_i32 : i32, i32
  }
  func.func @transform_13(%arg0: i32) -> (i32, i32) {
    %c0_i32 = arith.constant 0 : i32
    %c0_i32_0 = arith.constant 0 : i32
    return %arg0, %c0_i32 : i32, i32
  }
}

</mosaic_0001>

<bundles_post_ra>
// kernel: tpu_custom_call.1
= control target key start
LH: loop header
LB: loop body
LE: loop exit
PB: predicated region body
PF: predicated region fallthrough
CT: control target
= control target key end

     0   :  { %19 = vsyncpa [#allocation3], 0  ;;  %s4007_s0 = inlined_call_operand.hbm [shape: f32[128,256], index: 0, kind: input, shape index: {}]   ;;  %s4008_s1 = inlined_call_operand.vmem [shape: f32[128,32], index: 1, kind: input, shape index: {}]   ;;  %s4009_s2 = inlined_call_operand.hbm [shape: bf16[256,256], index: 2, kind: input, shape index: {}]   ;;  %s4010_s3 = inlined_call_operand.vmem [shape: bf16[256,128], index: 3, kind: input, shape index: {}]   ;;  %s4011_s4 = inlined_call_operand.hbm [shape: bf16[128,128], index: 4, kind: input, shape index: {}]   ;;  %s4012_s5 = inlined_call_operand.hbm [shape: f32[128,128], index: 5, kind: input, shape index: {}]   ;;  %s4013_s6 = inlined_call_operand.vmem [shape: bf16[32,128], index: 6, kind: input, shape index: {}]   ;;  %s4014_s7 = inlined_call_operand.hbm [shape: bf16[128,128], index: 7, kind: input, shape index: {}]   ;;  %s4015_s8 = inlined_call_operand.hbm [shape: bf16[128,256], index: 8, kind: input, shape index: {}]   ;;  %s4016_s9 = inlined_call_operand.hbm [shape: bf16[256,256], index: 9, kind: input, shape index: {}]   ;;  %s4017_s10 = inlined_call_operand.vmem [shape: f32[1,1408], index: 10, kind: input, shape index: {}]   ;;  %s4018_s11 = inlined_call_operand.hbm [shape: f32[128,256], index: 11, kind: output, shape index: {0}]   ;;  %s4019_s12 = inlined_call_operand.vmem [shape: f32[128,32], index: 12, kind: output, shape index: {1}]   ;;  %s4020_s13 = inlined_call_operand.vmem [shape: f32[128,32], index: 13, kind: output, shape index: {2}]  }
   0x1   :  { %20 = vsyncpa [#allocation6], 0 }
   0x2   :  { %21 = vsyncpa [#allocation9], 0 }
   0x3   :  { %22 = vsyncpa [#allocation12], 0 }
   0x4   :  { %23 = vsyncpa [#allocation4], 0  ;;  %s3255_s25 = smov [#allocation5]   ;;  %s3069_s29 = scalar_lea.hbm %s4009_s2, 4096 }
   0x5   :  { %s43_s26 = sshll.u32 %s3255_s25, 4  ;;  %p3070_p0 = scmp.ne.s32.totalorder %s4009_s2, %s3069_s29  ;;  %s44_s26 = int_to_ptr.vmem [resolvable:$true] %s43_s26 }
   0x6   :  { %p3073_p1 = scmp.lt.u32.totalorder %s3069_s29, %s4009_s2 }
   0x8   :  { %p3075_p2 = pnand %p3073_p1, %p3070_p0 }
   0xa   :  { %3078 = shalt.err (!%p3075_p2)
}
   0xb   :  { %s3079_s17 = scalar_lea.vmem %s44_s26, 4096  ;;  %p3084_p4 = scmp.lt.s32.totalorder %s44_s26, %s44_s26 }
   0xc   :  { %p3080_p3 = scmp.ne.s32.totalorder %s44_s26, %s3079_s17  ;;  %p3085_p5 = scmp.lt.s32.totalorder %s3079_s17, %s3079_s17 }
   0xe   :  { %p3086_p6 = por %p3085_p5, %p3084_p4 }
  0x10   :  { %p3087_p7 = pnand %p3086_p6, %p3080_p3 }
  0x12   :  { %3090 = shalt.err (!%p3087_p7)
}
  0x13   :  { %s3256_s18 = smov 128   ;;  %s3257_s19 = smov 8  }
  0x14   :  { %49 = dma.hbm_to_vmem [thread:$0]  %s4009_s2, 4096, %s44_s26, [#allocation6], %s3256_s18, %s3256_s18, %s3257_s19  }
  0x15   :  { %s3258_s22 = smov [#allocation8]   ;;  %s3259_s24 = smov [#allocation11]  }
  0x16   :  { %s69_s23 = sshll.u32 %s3258_s22, 4  ;;  %s95_s25 = sshll.u32 %s3259_s24, 4  ;;  %s70_s23 = int_to_ptr.vmem [resolvable:$true] %s69_s23  ;;  %s96_s25 = int_to_ptr.vmem [resolvable:$true] %s95_s25 }
  0x17   :  { %s3091_s29 = scalar_lea.hbm %s4012_s5, 2048 }
  0x18   :  { %p3092_p8 = scmp.ne.s32.totalorder %s4012_s5, %s3091_s29  ;;  %p3095_p9 = scmp.lt.u32.totalorder %s3091_s29, %s4012_s5 }
  0x1a   :  { %p3097_p10 = pnand %p3095_p9, %p3092_p8 }
  0x1c   :  { %3100 = shalt.err (!%p3097_p10)
}
  0x1d   :  { %s3101_s2 = scalar_lea.vmem %s70_s23, 2048  ;;  %p3106_p12 = scmp.lt.s32.totalorder %s70_s23, %s70_s23 }
  0x1e   :  { %p3102_p11 = scmp.ne.s32.totalorder %s70_s23, %s3101_s2  ;;  %p3107_p13 = scmp.lt.s32.totalorder %s3101_s2, %s3101_s2 }
  0x20   :  { %p3108_p0 = por %p3107_p13, %p3106_p12 }
  0x22   :  { %p3109_p1 = pnand %p3108_p0, %p3102_p11 }
  0x24   :  { %3112 = shalt.err (!%p3109_p1)
}
  0x25   :  { %75 = dma.hbm_to_vmem [thread:$0]  %s4012_s5, 2048, %s70_s23, [#allocation9], %s3256_s18, %s3256_s18, %s3257_s19  }
  0x26   :  { %s3113_s22 = scalar_lea.hbm %s4015_s8, 2048 }
  0x27   :  { %p3114_p2 = scmp.ne.s32.totalorder %s4015_s8, %s3113_s22  ;;  %p3117_p3 = scmp.lt.u32.totalorder %s3113_s22, %s4015_s8 }
  0x29   :  { %p3119_p4 = pnand %p3117_p3, %p3114_p2 }
  0x2b   :  { %3122 = shalt.err (!%p3119_p4)
}
  0x2c   :  { %s3123_s30 = scalar_lea.vmem %s96_s25, 2048  ;;  %p3128_p6 = scmp.lt.s32.totalorder %s96_s25, %s96_s25 }
  0x2d   :  { %p3124_p5 = scmp.ne.s32.totalorder %s96_s25, %s3123_s30  ;;  %p3129_p7 = scmp.lt.s32.totalorder %s3123_s30, %s3123_s30 }
  0x2f   :  { %p3130_p8 = por %p3129_p7, %p3128_p6 }
  0x31   :  { %p3131_p9 = pnand %p3130_p8, %p3124_p5 }
  0x33   :  { %3134 = shalt.err (!%p3131_p9)
}
  0x34   :  { %101 = dma.hbm_to_vmem [thread:$0]  %s4015_s8, 2048, %s96_s25, [#allocation12], %s3256_s18, %s3256_s18, %s3257_s19  }
  0x35   :  { %s3260_s14 = smov [#allocation2]   ;;  %s3135_s26 = scalar_lea.hbm %s4007_s0, 4096 }
  0x36   :  { %s29_s15 = sshll.u32 %s3260_s14, 4  ;;  %p3136_p10 = scmp.ne.s32.totalorder %s4007_s0, %s3135_s26  ;;  %s30_s15 = int_to_ptr.vmem [resolvable:$true] %s29_s15 }
  0x37   :  { %p3139_p11 = scmp.lt.u32.totalorder %s3135_s26, %s4007_s0 }
  0x39   :  { %p3141_p12 = pnand %p3139_p11, %p3136_p10 }
  0x3b   :  { %3144 = shalt.err (!%p3141_p12)
}
  0x3c   :  { %s3145_s24 = scalar_lea.vmem %s30_s15, 4096  ;;  %p3150_p0 = scmp.lt.s32.totalorder %s30_s15, %s30_s15 }
  0x3d   :  { %p3146_p13 = scmp.ne.s32.totalorder %s30_s15, %s3145_s24  ;;  %p3151_p1 = scmp.lt.s32.totalorder %s3145_s24, %s3145_s24 }
  0x3f   :  { %p3152_p2 = por %p3151_p1, %p3150_p0 }
  0x41   :  { %p3153_p3 = pnand %p3152_p2, %p3146_p13 }
  0x43   :  { %3156 = shalt.err (!%p3153_p3)
}
  0x44   :  { %s3261_s8 = smov 256   ;;  %s3262_s25 = smov 16  }
  0x45   :  { %35 = dma.hbm_to_vmem [thread:$0]  %s4007_s0, 4096, %s30_s15, [#allocation3], %s3261_s8, %s3261_s8, %s3262_s25  }
  0x46   :  { %s3263_s29 = smov [#allocation7]   ;;  %s3157_s14 = scalar_lea.hbm %s4011_s4, 1024 }
  0x47   :  { %s57_s30 = sshll.u32 %s3263_s29, 4  ;;  %p3158_p4 = scmp.ne.s32.totalorder %s4011_s4, %s3157_s14  ;;  %s58_s30 = int_to_ptr.vmem [resolvable:$true] %s57_s30 }
  0x48   :  { %p3161_p5 = scmp.lt.u32.totalorder %s3157_s14, %s4011_s4 }
  0x4a   :  { %p3163_p6 = pnand %p3161_p5, %p3158_p4 }
  0x4c   :  { %3166 = shalt.err (!%p3163_p6)
}
  0x4d   :  { %s3167_s20 = scalar_lea.vmem %s58_s30, 1024  ;;  %p3172_p8 = scmp.lt.s32.totalorder %s58_s30, %s58_s30 }
  0x4e   :  { %p3168_p7 = scmp.ne.s32.totalorder %s58_s30, %s3167_s20  ;;  %p3173_p9 = scmp.lt.s32.totalorder %s3167_s20, %s3167_s20 }
  0x50   :  { %p3174_p10 = por %p3173_p9, %p3172_p8 }
  0x52   :  { %p3175_p11 = pnand %p3174_p10, %p3168_p7 }
  0x54   :  { %3178 = shalt.err (!%p3175_p11)
}
  0x55   :  { %s3264_s0 = smov 64   ;;  %s3265_s15 = smov 4  }
  0x56   :  { %63 = dma.hbm_to_vmem [thread:$0]  %s4011_s4, 1024, %s58_s30, [#allocation6], %s3264_s0, %s3264_s0, %s3265_s15  }
  0x57   :  { %s3266_s24 = smov [#allocation10]   ;;  %s3267_s28 = smov [#allocation13]  }
  0x58   :  { %s83_s27 = sshll.u32 %s3266_s24, 4  ;;  %s107_s29 = sshll.u32 %s3267_s28, 4  ;;  %s84_s27 = int_to_ptr.vmem [resolvable:$true] %s83_s27  ;;  %s108_s29 = int_to_ptr.vmem [resolvable:$true] %s107_s29 }
  0x59   :  { %s3179_s14 = scalar_lea.hbm %s4014_s7, 1024 }
  0x5a   :  { %p3180_p12 = scmp.ne.s32.totalorder %s4014_s7, %s3179_s14  ;;  %p3183_p13 = scmp.lt.u32.totalorder %s3179_s14, %s4014_s7 }
  0x5c   :  { %p3185_p0 = pnand %p3183_p13, %p3180_p12 }
  0x5e   :  { %3188 = shalt.err (!%p3185_p0)
}
  0x5f   :  { %s3189_s4 = scalar_lea.vmem %s84_s27, 1024  ;;  %p3194_p2 = scmp.lt.s32.totalorder %s84_s27, %s84_s27 }
  0x60   :  { %p3190_p1 = scmp.ne.s32.totalorder %s84_s27, %s3189_s4  ;;  %p3195_p3 = scmp.lt.s32.totalorder %s3189_s4, %s3189_s4 }
  0x62   :  { %p3196_p4 = por %p3195_p3, %p3194_p2 }
  0x64   :  { %p3197_p5 = pnand %p3196_p4, %p3190_p1 }
  0x66   :  { %3200 = shalt.err (!%p3197_p5)
}
  0x67   :  { %89 = dma.hbm_to_vmem [thread:$0]  %s4014_s7, 1024, %s84_s27, [#allocation9], %s3264_s0, %s3264_s0, %s3265_s15  }
  0x68   :  { %s3201_s24 = scalar_lea.hbm %s4016_s9, 4096 }
  0x69   :  { %p3202_p6 = scmp.ne.s32.totalorder %s4016_s9, %s3201_s24  ;;  %p3205_p7 = scmp.lt.u32.totalorder %s3201_s24, %s4016_s9 }
  0x6b   :  { %p3207_p8 = pnand %p3205_p7, %p3202_p6 }
  0x6d   :  { %3210 = shalt.err (!%p3207_p8)
}
  0x6e   :  { %s3211_s16 = scalar_lea.vmem %s108_s29, 4096  ;;  %p3216_p10 = scmp.lt.s32.totalorder %s108_s29, %s108_s29 }
  0x6f   :  { %p3212_p9 = scmp.ne.s32.totalorder %s108_s29, %s3211_s16  ;;  %p3217_p11 = scmp.lt.s32.totalorder %s3211_s16, %s3211_s16 }
  0x71   :  { %p3218_p12 = por %p3217_p11, %p3216_p10 }
  0x73   :  { %p3219_p13 = pnand %p3218_p12, %p3212_p9 }
  0x75   :  { %3222 = shalt.err (!%p3219_p13)
}
  0x76   :  { %113 = dma.hbm_to_vmem [thread:$0]  %s4016_s9, 4096, %s108_s29, [#allocation12], %s3256_s18, %s3256_s18, %s3257_s19  }
  0x77   :  { %3245 = dma.done.wait [#allocation3], 4096  }
  0x78   :  { %3246 = vsyncadd [#allocation3], 4294963200 }
  0x79   :  { %3247 = dma.done.wait [#allocation6], 5120  }
  0x7a   :  { %3248 = vsyncadd [#allocation6], 4294962176 }
  0x7b   :  { %3249 = dma.done.wait [#allocation9], 3072  }
  0x7c   :  { %3250 = vsyncadd [#allocation9], 4294964224 }
  0x7d   :  { %3251 = dma.done.wait [#allocation12], 6144  }
  0x7e   :  { %3252 = vsyncadd [#allocation12], 4294961152  ;;  %v2883_v0 = vld [vmem:[#allocation5 + $0x4] ss:$8 sps:$4 sm:$0xff]   ;;  %v2885_v1 = vld [vmem:[#allocation5] ss:$8 sps:$4 sm:$0xff]  }
  0x7f   :  { %390 = vmatprep.subr.bf16.mxu0 %v2883_v0  ;;  %v2886_v2 = vld [vmem:[#allocation5 + $0x14] ss:$8 sps:$4 sm:$0xff]   ;;  %v2888_v3 = vld [vmem:[#allocation5 + $0x10] ss:$8 sps:$4 sm:$0xff]   ;;  %v2889_v4 = vld [vmem:[#allocation5 + $0x24] ss:$8 sps:$4 sm:$0xff]  }
  0x80   :  { %391 = vmatpush1.bf16.msra.mxu0 %v2885_v1  ;;  %v2891_v5 = vld [vmem:[#allocation5 + $0x20] ss:$8 sps:$4 sm:$0xff]   ;;  %v2892_v6 = vld [vmem:[#allocation5 + $0x34] ss:$8 sps:$4 sm:$0xff]   ;;  %v2894_v7 = vld [vmem:[#allocation5 + $0x30] ss:$8 sps:$4 sm:$0xff]  }
  0x81   :  { %392 = vmatprep.subr.bf16.mxu0 %v2886_v2  ;;  %v2895_v8 = vld [vmem:[#allocation5 + $0x44] ss:$8 sps:$4 sm:$0xff]   ;;  %v2897_v9 = vld [vmem:[#allocation5 + $0x40] ss:$8 sps:$4 sm:$0xff]   ;;  %v2898_v10 = vld [vmem:[#allocation5 + $0x54] ss:$8 sps:$4 sm:$0xff]  }
  0x82   :  { %v2900_v11 = vld [vmem:[#allocation5 + $0x50] ss:$8 sps:$4 sm:$0xff]   ;;  %v2901_v12 = vld [vmem:[#allocation5 + $0x64] ss:$8 sps:$4 sm:$0xff]   ;;  %v2903_v16 = vld [vmem:[#allocation5 + $0x60] ss:$8 sps:$4 sm:$0xff]  }
  0x83   :  { %v139_v13 = vld [vmem:[#allocation2 + $0x8] sm:$0xff]  ;;  %v141_v14 = vld [vmem:[#allocation2 + $0x18] sm:$0xff]  ;;  %v2931_v22 = vld [vmem:[%s4010_s3 + $0x40] sm:$0xff]   ;;  %vm1350_vm0 = vcmask 261120   ;;  %s3268_s17 = smov 96  }
  0x84   :  { %393 = vmatpush1.bf16.msra.mxu0 %v2888_v3  ;;  %v171_v15 = vpack.c.bf16 %v141_v14, %v139_v13  ;;  %v2904_v17 = vld [vmem:[#allocation5 + $0x74] ss:$8 sps:$4 sm:$0xff]   ;;  %v2906_v18 = vld [vmem:[#allocation5 + $0x70] ss:$8 sps:$4 sm:$0xff]   ;;  %v2907_v19 = vld [vmem:[#allocation5 + $0x84] ss:$8 sps:$4 sm:$0xff]   ;;  %2557 = vmatprep.subr.bf16.mxu1 %v2931_v22 }
  0x85   :  { %394 = vmatprep.subr.bf16.mxu0 %v2889_v4  ;;  %v2909_v20 = vld [vmem:[#allocation5 + $0x80] ss:$8 sps:$4 sm:$0xff]   ;;  %v2910_v21 = vld [vmem:[#allocation5 + $0x94] ss:$8 sps:$4 sm:$0xff]   ;;  %v2912_v23 = vld [vmem:[#allocation5 + $0x90] ss:$8 sps:$4 sm:$0xff]  }
  0x86   :  { %422 = vmatprep.mubr.bf16.mxu0 %v171_v15  ;;  %v2932_v24 = vld [vmem:[%s4010_s3] sm:$0xff]   ;;  %v2933_v26 = vld [vmem:[%s4010_s3 + $0x48] sm:$0xff]   ;;  %v2935_v28 = vld [vmem:[%s4010_s3 + $0x50] sm:$0xff]  }
  0x87   :  { %v2913_v25 = vld [vmem:[#allocation5 + $0xa4] ss:$8 sps:$4 sm:$0xff]   ;;  %2558 = vmatpush3.bf16.msra.mxu1 %v2932_v24  ;;  %v2915_v29 = vld [vmem:[#allocation5 + $0xa0] ss:$8 sps:$4 sm:$0xff]   ;;  %v2916_v30 = vld [vmem:[#allocation5 + $0xb4] ss:$8 sps:$4 sm:$0xff]  }
  0x88   :  { %395 = vmatpush1.bf16.msra.mxu0 %v2891_v5  ;;  %v2934_v27 = vld [vmem:[%s4010_s3 + $0x8] sm:$0xff]   ;;  %2559 = vmatprep.subr.bf16.mxu1 %v2933_v26  ;;  %v2936_v31 = vld [vmem:[%s4010_s3 + $0x10] sm:$0xff]   ;;  %v2937_v32 = vld [vmem:[%s4010_s3 + $0x58] sm:$0xff]  }
  0x89   :  { %396 = vmatprep.subr.bf16.mxu0 %v2892_v6  ;;  %v2918_v33 = vld [vmem:[#allocation5 + $0xb0] ss:$8 sps:$4 sm:$0xff]   ;;  %v2919_v34 = vld [vmem:[#allocation5 + $0xc4] ss:$8 sps:$4 sm:$0xff]   ;;  %v2921_v37 = vld [vmem:[#allocation5 + $0xc0] ss:$8 sps:$4 sm:$0xff]  }
  0x8a   :  { %v2938_v35 = vld [vmem:[%s4010_s3 + $0x18] sm:$0xff]   ;;  %v2939_v36 = vld [vmem:[%s4010_s3 + $0x60] sm:$0xff]   ;;  %v2941_v40 = vld [vmem:[%s4010_s3 + $0x68] sm:$0xff]  }
  0x8b   :  { %2560 = vmatpush3.bf16.msra.mxu1 %v2934_v27  ;;  %v2940_v38 = vld [vmem:[%s4010_s3 + $0x20] sm:$0xff]   ;;  %v2922_v39 = vld [vmem:[#allocation5 + $0xd4] ss:$8 sps:$4 sm:$0xff]   ;;  %v2924_v41 = vld [vmem:[#allocation5 + $0xd0] ss:$8 sps:$4 sm:$0xff]  }
  0x8c   :  { %397 = vmatpush1.bf16.msra.mxu0 %v2894_v7  ;;  %2561 = vmatprep.subr.bf16.mxu1 %v2935_v28  ;;  %v2925_v42 = vld [vmem:[#allocation5 + $0xe4] ss:$8 sps:$4 sm:$0xff]   ;;  %v2927_v43 = vld [vmem:[#allocation5 + $0xe0] ss:$8 sps:$4 sm:$0xff]   ;;  %v2928_v44 = vld [vmem:[#allocation5 + $0xf4] ss:$8 sps:$4 sm:$0xff]  }
  0x8d   :  { %398 = vmatprep.subr.bf16.mxu0 %v2895_v8  ;;  %v2930_v45 = vld [vmem:[#allocation5 + $0xf0] ss:$8 sps:$4 sm:$0xff]   ;;  %v138_v46 = vld [vmem:[#allocation2] sm:$0xff]  ;;  %v143_v48 = vld [vmem:[#allocation2 + $0x28] sm:$0xff] }
  0x8e   :  { %v140_v47 = vld [vmem:[#allocation2 + $0x10] sm:$0xff]  ;;  %v145_v49 = vld [vmem:[#allocation2 + $0x38] sm:$0xff]  ;;  %v142_v52 = vld [vmem:[#allocation2 + $0x20] sm:$0xff] }
  0x8f   :  { %2562 = vmatpush3.bf16.msra.mxu1 %v2936_v31  ;;  %v170_v50 = vpack.c.bf16 %v140_v47, %v138_v46  ;;  %v173_v51 = vpack.c.bf16 %v145_v49, %v143_v48  ;;  %v144_v53 = vld [vmem:[#allocation2 + $0x30] sm:$0xff]  ;;  %v147_v54 = vld [vmem:[#allocation2 + $0x48] sm:$0xff]  ;;  %v149_v55 = vld [vmem:[#allocation2 + $0x58] sm:$0xff] }
  0x90   :  { %399 = vmatpush1.bf16.msra.mxu0 %v2897_v9  ;;  %2563 = vmatprep.subr.bf16.mxu1 %v2937_v32  ;;  %v172_v56 = vpack.c.bf16 %v144_v53, %v142_v52  ;;  %v175_v57 = vpack.c.bf16 %v149_v55, %v147_v54  ;;  %v146_v58 = vld [vmem:[#allocation2 + $0x40] sm:$0xff]  ;;  %v148_v59 = vld [vmem:[#allocation2 + $0x50] sm:$0xff]  ;;  %v151_v60 = vld [vmem:[#allocation2 + $0x68] sm:$0xff] }
  0x91   :  { %400 = vmatprep.subr.bf16.mxu0 %v2898_v10  ;;  %v153_v61 = vld [vmem:[#allocation2 + $0x78] sm:$0xff]  ;;  %v174_v62 = vpack.c.bf16 %v148_v59, %v146_v58  ;;  %v150_v0 = vld [vmem:[#allocation2 + $0x60] sm:$0xff]  ;;  %v152_v1 = vld [vmem:[#allocation2 + $0x70] sm:$0xff] }
  0x92   :  { %v177_v63 = vpack.c.bf16 %v153_v61, %v151_v60  ;;  %v155_v2 = vld [vmem:[#allocation2 + $0x88] sm:$0xff]  ;;  %v157_v3 = vld [vmem:[#allocation2 + $0x98] sm:$0xff]  ;;  %v176_v4 = vpack.c.bf16 %v152_v1, %v150_v0  ;;  %v154_v6 = vld [vmem:[#allocation2 + $0x80] sm:$0xff] }
  0x93   :  { %2564 = vmatpush3.bf16.msra.mxu1 %v2938_v35  ;;  %v179_v5 = vpack.c.bf16 %v157_v3, %v155_v2  ;;  %v156_v7 = vld [vmem:[#allocation2 + $0x90] sm:$0xff]  ;;  %v159_v8 = vld [vmem:[#allocation2 + $0xa8] sm:$0xff]  ;;  %v161_v9 = vld [vmem:[#allocation2 + $0xb8] sm:$0xff] }
  0x94   :  { %401 = vmatpush1.bf16.msra.mxu0 %v2900_v11  ;;  %2565 = vmatprep.subr.bf16.mxu1 %v2939_v36  ;;  %v178_v10 = vpack.c.bf16 %v156_v7, %v154_v6  ;;  %v181_v11 = vpack.c.bf16 %v161_v9, %v159_v8  ;;  %v160_v13 = vld [vmem:[#allocation2 + $0xb0] sm:$0xff]  ;;  %v163_v14 = vld [vmem:[#allocation2 + $0xc8] sm:$0xff]  ;;  %v165_v15 = vld [vmem:[#allocation2 + $0xd8] sm:$0xff] }
  0x95   :  { %402 = vmatprep.subr.bf16.mxu0 %v2901_v12  ;;  %v158_v12 = vld [vmem:[#allocation2 + $0xa0] sm:$0xff]  ;;  %v2942_v27 = vld [vmem:[%s4010_s3 + $0x28] sm:$0xff]   ;;  %v2943_v28 = vld [vmem:[%s4010_s3 + $0x70] sm:$0xff]  }
  0x96   :  { %v166_v24 = vld [vmem:[#allocation2 + $0xe0] sm:$0xff]  ;;  %v2946_v31 = vld [vmem:[%s4010_s3 + $0x38] sm:$0xff]   ;;  %v2949_v1 = vld [vmem:[#allocation7 + $0x10] sm:$0xff]  }
  0x97   :  { %2566 = vmatpush3.bf16.msra.mxu1 %v2940_v38  ;;  %v2947_v32 = vld [vmem:[#allocation7] sm:$0xff]   ;;  %v2950_v9 = vld [vmem:[#allocation7 + $0x18] sm:$0xff]  }
  0x98   :  { %403 = vmatpush1.bf16.msra.mxu0 %v2903_v16  ;;  %2567 = vmatprep.subr.bf16.mxu1 %v2941_v40  ;;  %v180_v16 = vpack.c.bf16 %v160_v13, %v158_v12  ;;  %v218_v36 = vld [vmem:[%s4017_s10] sm:$0x3] }
  0x99   :  { %404 = vmatprep.subr.bf16.mxu0 %v2904_v17  ;;  %v183_v17 = vpack.c.bf16 %v165_v15, %v163_v14 }
  0x9b   :  { %2568 = vmatpush3.bf16.msra.mxu1 %v2942_v27 }
  0x9c   :  { %405 = vmatpush1.bf16.msra.mxu0 %v2906_v18  ;;  %v162_v18 = vld [vmem:[#allocation2 + $0xc0] sm:$0xff]  ;;  %2569 = vmatprep.subr.bf16.mxu1 %v2943_v28 }
  0x9d   :  { %406 = vmatprep.subr.bf16.mxu0 %v2907_v19  ;;  %v164_v19 = vld [vmem:[#allocation2 + $0xd0] sm:$0xff] }
  0x9e   :  { %v182_v22 = vpack.c.bf16 %v164_v19, %v162_v18  ;;  %v2951_v18 = vld [vmem:[#allocation7 + $0x20] sm:$0xff]  }
  0xa0   :  { %407 = vmatpush1.bf16.msra.mxu0 %v2909_v20  ;;  %v167_v20 = vld [vmem:[#allocation2 + $0xe8] sm:$0xff] }
  0xa1   :  { %408 = vmatprep.subr.bf16.mxu0 %v2910_v21  ;;  %v169_v21 = vld [vmem:[#allocation2 + $0xf8] sm:$0xff] }
  0xa4   :  { %409 = vmatpush1.bf16.msra.mxu0 %v2912_v23  ;;  %v185_v23 = vpack.c.bf16 %v169_v21, %v167_v20 }
  0xa5   :  { %410 = vmatprep.subr.bf16.mxu0 %v2913_v25  ;;  %v168_v25 = vld [vmem:[#allocation2 + $0xf0] sm:$0xff] }
  0xa6   :  { %v184_v26 = vpack.c.bf16 %v168_v25, %v166_v24  ;;  %v2952_v25 = vld [vmem:[#allocation7 + $0x28] sm:$0xff]  }
  0xa8   :  { %411 = vmatpush1.bf16.msra.mxu0 %v2915_v29  ;;  %v2944_v29 = vld [vmem:[%s4010_s3 + $0x30] sm:$0xff]  }
  0xa9   :  { %412 = vmatprep.subr.bf16.mxu0 %v2916_v30  ;;  %2570 = vmatpush3.bf16.msra.mxu1 %v2944_v29  ;;  %v2945_v30 = vld [vmem:[%s4010_s3 + $0x78] sm:$0xff]  }
  0xaa   :  { %2571 = vmatprep.subr.bf16.mxu1 %v2945_v30 }
  0xac   :  { %413 = vmatpush1.bf16.msra.mxu0 %v2918_v33  ;;  %v220_v33 = vlaneseq }
  0xad   :  { %414 = vmatprep.subr.bf16.mxu0 %v2919_v34  ;;  %2572 = vmatpush3.bf16.msra.mxu1 %v2946_v31 }
  0xae   :  { %2695 = vmatprep.subr.bf16.mxu1 %v2947_v32  ;;  %v221_v34 = vshrl.u32 %v220_v33, 7 }
  0xb0   :  { %415 = vmatpush1.bf16.msra.mxu0 %v2921_v37  ;;  %v3488_v35 = vsub.s32 0, %v221_v34  ;;  %v3493_v37 = vsub.s32 1, %v221_v34 }
  0xb1   :  { %416 = vmatprep.subr.bf16.mxu0 %v2922_v39 }
  0xb2   :  { %v3496_v38 = vrot.slane %v218_v36, %v3488_v35  ;;  %v3499_v39 = vrot.slane %v218_v36, %v3493_v37 }
  0xb4   :  { %417 = vmatpush1.bf16.msra.mxu0 %v2924_v41 }
  0xb5   :  { %418 = vmatprep.subr.bf16.mxu0 %v2925_v42 }
  0xb8   :  { %419 = vmatpush1.bf16.msra.mxu0 %v2927_v43 }
  0xb9   :  { %420 = vmatprep.subr.bf16.mxu0 %v2928_v44 }
  0xbc   :  { %421 = vmatpush1.bf16.msra.mxu0 %v2930_v45 }
  0xbf   :  { %423 = vmatmul.mubr.bf16.vlgmr.msra.gmra.mrb[0].mxu0 %v170_v50 }
  0xc0   :  { %432 = vmatprep.mubr.bf16.mxu0 %v173_v51 }
  0xc7   :  { %433 = vmatmul.mubr.bf16.gmra.mrb[4].mxu0 %v172_v56 }
  0xc8   :  { %442 = vmatprep.mubr.bf16.mxu0 %v175_v57  ;;  %v2948_v57 = vld [vmem:[#allocation7 + $0x8] sm:$0xff]  }
  0xcf   :  { %443 = vmatmul.mubr.bf16.gmra.mrb[8].mxu0 %v174_v62 }
  0xd0   :  { %452 = vmatprep.mubr.bf16.mxu0 %v177_v63 }
  0xd7   :  { %453 = vmatmul.mubr.bf16.gmra.mrb[12].mxu0 %v176_v4 }
  0xd8   :  { %462 = vmatprep.mubr.bf16.mxu0 %v179_v5 }
  0xdf   :  { %463 = vmatmul.mubr.bf16.gmra.mrb[16].mxu0 %v178_v10 }
  0xe0   :  { %472 = vmatprep.mubr.bf16.mxu0 %v181_v11 }
  0xe7   :  { %473 = vmatmul.mubr.bf16.gmra.mrb[20].mxu0 %v180_v16 }
  0xe8   :  { %482 = vmatprep.mubr.bf16.mxu0 %v183_v17 }
  0xef   :  { %483 = vmatmul.mubr.bf16.gmra.mrb[24].mxu0 %v182_v22 }
  0xf0   :  { %492 = vmatprep.mubr.bf16.mxu0 %v185_v23 }
  0xf7   :  { %493 = vmatmul.mubr.bf16.gmra.mrb[28].mxu0 %v184_v26 }
 0x192   :  { %v424_v40 = vpop.f32.mrb[0].mxu0 }
 0x193   :  { %v425_v41 = vadd.f32 %v424_v40, %v3496_v38  ;;  %v426_v42 = vpop.f32.mrb[1].mxu0 }
 0x194   :  { %v427_v43 = vadd.f32 %v426_v42, %v3499_v39  ;;  %v428_v44 = vpop.f32.mrb[2].mxu0 }
 0x195   :  { %v429_v45 = vadd.f32 %v428_v44, %v3496_v38  ;;  %v430_v46 = vpop.f32.mrb[3].mxu0  ;;  %v503_v48 = vmax.f32 %v425_v41, 0.0 }
 0x196   :  { %v431_v47 = vadd.f32 %v430_v46, %v3499_v39  ;;  %v504_v50 = vmax.f32 %v427_v43, 0.0 }
 0x197   :  { %v505_v49 = vmax.f32 %v429_v45, 0.0 }
 0x198   :  { %v506_v51 = vmax.f32 %v431_v47, 0.0 }
 0x199   :  { %v535_v52 = vpack.c.bf16 %v505_v49, %v503_v48 }
 0x19a   :  { %v434_v53 = vpop.f32.mrb[4].mxu0  ;;  %v536_v54 = vpack.c.bf16 %v506_v51, %v504_v50 }
 0x19b   :  { %v435_v55 = vadd.f32 %v434_v53, %v3496_v38  ;;  %v436_v56 = vpop.f32.mrb[5].mxu0 }
 0x19c   :  { %v437_v58 = vadd.f32 %v436_v56, %v3499_v39  ;;  %v438_v59 = vpop.f32.mrb[6].mxu0  ;;  %718 = vmatprep.mubr.bf16.mxu1 %v536_v54 }
 0x19d   :  { %v439_v60 = vadd.f32 %v438_v59, %v3496_v38  ;;  %v440_v61 = vpop.f32.mrb[7].mxu0  ;;  %719 = vmatmul.mubr.bf16.vlgmr.msra.gmra.mrb[0].mxu1 %v535_v52  ;;  %v507_v63 = vmax.f32 %v435_v55, 0.0 }
 0x19e   :  { %v441_v62 = vadd.f32 %v440_v61, %v3499_v39  ;;  %2696 = vmatpush3.bf16.msra.mxu1 %v2947_v32  ;;  %v508_v2 = vmax.f32 %v437_v58, 0.0 }
 0x19f   :  { %v509_v0 = vmax.f32 %v439_v60, 0.0  ;;  %2697 = vmatprep.subr.bf16.mxu1 %v2948_v57 }
 0x1a0   :  { %v510_v3 = vmax.f32 %v441_v62, 0.0 }
 0x1a1   :  { %v537_v4 = vpack.c.bf16 %v509_v0, %v507_v63 }
 0x1a2   :  { %v538_v5 = vpack.c.bf16 %v510_v3, %v508_v2  ;;  %v444_v6 = vpop.f32.mrb[8].mxu0  ;;  %2698 = vmatpush3.bf16.msra.mxu1 %v2948_v57 }
 0x1a3   :  { %v445_v7 = vadd.f32 %v444_v6, %v3496_v38  ;;  %v446_v8 = vpop.f32.mrb[9].mxu0  ;;  %2699 = vmatprep.subr.bf16.mxu1 %v2949_v1 }
 0x1a4   :  { %v447_v10 = vadd.f32 %v446_v8, %v3499_v39  ;;  %v448_v11 = vpop.f32.mrb[10].mxu0  ;;  %726 = vmatprep.mubr.bf16.mxu1 %v538_v5 }
 0x1a5   :  { %v511_v12 = vmax.f32 %v445_v7, 0.0  ;;  %v449_v13 = vadd.f32 %v448_v11, %v3496_v38  ;;  %v450_v14 = vpop.f32.mrb[11].mxu0  ;;  %727 = vmatmul.mubr.bf16.gmra.mrb[4].mxu1 %v537_v4 }
 0x1a6   :  { %v512_v15 = vmax.f32 %v447_v10, 0.0  ;;  %v451_v16 = vadd.f32 %v450_v14, %v3499_v39  ;;  %2700 = vmatpush3.bf16.msra.mxu1 %v2949_v1 }
 0x1a7   :  { %v513_v17 = vmax.f32 %v449_v13, 0.0  ;;  %2701 = vmatprep.subr.bf16.mxu1 %v2950_v9 }
 0x1a8   :  { %v514_v19 = vmax.f32 %v451_v16, 0.0 }
 0x1a9   :  { %v539_v20 = vpack.c.bf16 %v513_v17, %v511_v12 }
 0x1aa   :  { %v540_v21 = vpack.c.bf16 %v514_v19, %v512_v15  ;;  %v454_v22 = vpop.f32.mrb[12].mxu0  ;;  %2702 = vmatpush3.bf16.msra.mxu1 %v2950_v9 }
 0x1ab   :  { %v455_v23 = vadd.f32 %v454_v22, %v3496_v38  ;;  %v456_v24 = vpop.f32.mrb[13].mxu0  ;;  %2703 = vmatprep.subr.bf16.mxu1 %v2951_v18 }
 0x1ac   :  { %v457_v26 = vadd.f32 %v456_v24, %v3499_v39  ;;  %v458_v27 = vpop.f32.mrb[14].mxu0  ;;  %734 = vmatprep.mubr.bf16.mxu1 %v540_v21 }
 0x1ad   :  { %v515_v28 = vmax.f32 %v455_v23, 0.0  ;;  %v459_v29 = vadd.f32 %v458_v27, %v3496_v38  ;;  %v460_v30 = vpop.f32.mrb[15].mxu0  ;;  %735 = vmatmul.mubr.bf16.gmra.mrb[8].mxu1 %v539_v20 }
 0x1ae   :  { %v516_v31 = vmax.f32 %v457_v26, 0.0  ;;  %v461_v32 = vadd.f32 %v460_v30, %v3499_v39  ;;  %2704 = vmatpush3.bf16.msra.mxu1 %v2951_v18 }
 0x1af   :  { %v517_v33 = vmax.f32 %v459_v29, 0.0  ;;  %2705 = vmatprep.subr.bf16.mxu1 %v2952_v25 }
 0x1b0   :  { %v518_v34 = vmax.f32 %v461_v32, 0.0 }
 0x1b1   :  { %v541_v36 = vpack.c.bf16 %v517_v33, %v515_v28  ;;  %v2953_v33 = vld [vmem:[#allocation7 + $0x30] sm:$0xff]  }
 0x1b2   :  { %v542_v40 = vpack.c.bf16 %v518_v34, %v516_v31  ;;  %v464_v41 = vpop.f32.mrb[16].mxu0  ;;  %2706 = vmatpush3.bf16.msra.mxu1 %v2952_v25  ;;  %v2954_v34 = vld [vmem:[#allocation7 + $0x38] sm:$0xff]  }
 0x1b3   :  { %v465_v42 = vadd.f32 %v464_v41, %v3496_v38  ;;  %v466_v43 = vpop.f32.mrb[17].mxu0  ;;  %2707 = vmatprep.subr.bf16.mxu1 %v2953_v33 }
 0x1b4   :  { %v467_v44 = vadd.f32 %v466_v43, %v3499_v39  ;;  %v468_v45 = vpop.f32.mrb[18].mxu0  ;;  %742 = vmatprep.mubr.bf16.mxu1 %v542_v40  ;;  %v992_v40 = vld [vmem:[#allocation8 + $0x8] sm:$0xff] }
 0x1b5   :  { %v519_v46 = vmax.f32 %v465_v42, 0.0  ;;  %v469_v47 = vadd.f32 %v468_v45, %v3496_v38  ;;  %v470_v48 = vpop.f32.mrb[19].mxu0  ;;  %743 = vmatmul.mubr.bf16.gmra.mrb[12].mxu1 %v541_v36  ;;  %v991_v36 = vld [vmem:[#allocation8] sm:$0xff] }
 0x1b6   :  { %v520_v49 = vmax.f32 %v467_v44, 0.0  ;;  %v471_v50 = vadd.f32 %v470_v48, %v3499_v39  ;;  %2708 = vmatpush3.bf16.msra.mxu1 %v2953_v33 }
 0x1b7   :  { %v521_v51 = vmax.f32 %v469_v47, 0.0  ;;  %2709 = vmatprep.subr.bf16.mxu1 %v2954_v34 }
 0x1b8   :  { %v522_v52 = vmax.f32 %v471_v50, 0.0 }
 0x1b9   :  { %v543_v53 = vpack.c.bf16 %v521_v51, %v519_v46 }
 0x1ba   :  { %v544_v54 = vpack.c.bf16 %v522_v52, %v520_v49  ;;  %v474_v55 = vpop.f32.mrb[20].mxu0  ;;  %2710 = vmatpush3.bf16.msra.mxu1 %v2954_v34 }
 0x1bb   :  { %v475_v56 = vadd.f32 %v474_v55, %v3496_v38  ;;  %v476_v57 = vpop.f32.mrb[21].mxu0 }
 0x1bc   :  { %v477_v58 = vadd.f32 %v476_v57, %v3499_v39  ;;  %v478_v59 = vpop.f32.mrb[22].mxu0  ;;  %750 = vmatprep.mubr.bf16.mxu1 %v544_v54 }
 0x1bd   :  { %v523_v60 = vmax.f32 %v475_v56, 0.0  ;;  %v479_v61 = vadd.f32 %v478_v59, %v3496_v38  ;;  %v480_v62 = vpop.f32.mrb[23].mxu0  ;;  %751 = vmatmul.mubr.bf16.gmra.mrb[16].mxu1 %v543_v53 }
 0x1be   :  { %v524_v63 = vmax.f32 %v477_v58, 0.0  ;;  %v481_v0 = vadd.f32 %v480_v62, %v3499_v39 }
 0x1bf   :  { %v525_v1 = vmax.f32 %v479_v61, 0.0  ;;  %v994_v61 = vld [vmem:[#allocation8 + $0x18] sm:$0xff] }
 0x1c0   :  { %v526_v2 = vmax.f32 %v481_v0, 0.0 }
 0x1c1   :  { %v545_v3 = vpack.c.bf16 %v525_v1, %v523_v60  ;;  %v993_v60 = vld [vmem:[#allocation8 + $0x10] sm:$0xff] }
 0x1c2   :  { %v546_v4 = vpack.c.bf16 %v526_v2, %v524_v63  ;;  %v484_v5 = vpop.f32.mrb[24].mxu0 }
 0x1c3   :  { %v485_v6 = vadd.f32 %v484_v5, %v3496_v38  ;;  %v486_v7 = vpop.f32.mrb[25].mxu0  ;;  %v2839_v5 = vpack.c.bf16 %v994_v61, %v993_v60 }
 0x1c4   :  { %v487_v8 = vadd.f32 %v486_v7, %v3499_v39  ;;  %v488_v9 = vpop.f32.mrb[26].mxu0  ;;  %758 = vmatprep.mubr.bf16.mxu1 %v546_v4  ;;  %v995_v7 = vld [vmem:[#allocation8 + $0x20] sm:$0xff] }
 0x1c5   :  { %v527_v10 = vmax.f32 %v485_v6, 0.0  ;;  %v489_v11 = vadd.f32 %v488_v9, %v3496_v38  ;;  %v490_v12 = vpop.f32.mrb[27].mxu0  ;;  %759 = vmatmul.mubr.bf16.gmra.mrb[20].mxu1 %v545_v3 }
 0x1c6   :  { %v528_v13 = vmax.f32 %v487_v8, 0.0  ;;  %v491_v14 = vadd.f32 %v490_v12, %v3499_v39  ;;  %v996_v8 = vld [vmem:[#allocation8 + $0x28] sm:$0xff] }
 0x1c7   :  { %v529_v15 = vmax.f32 %v489_v11, 0.0  ;;  %v2843_v12 = vpack.c.bf16 %v996_v8, %v995_v7 }
 0x1c8   :  { %v530_v16 = vmax.f32 %v491_v14, 0.0  ;;  %v998_v14 = vld [vmem:[#allocation8 + $0x38] sm:$0xff] }
 0x1c9   :  { %v547_v17 = vpack.c.bf16 %v529_v15, %v527_v10 }
 0x1ca   :  { %v548_v18 = vpack.c.bf16 %v530_v16, %v528_v13  ;;  %v494_v19 = vpop.f32.mrb[28].mxu0  ;;  %v997_v13 = vld [vmem:[#allocation8 + $0x30] sm:$0xff] }
 0x1cb   :  { %v495_v20 = vadd.f32 %v494_v19, %v3496_v38  ;;  %v496_v21 = vpop.f32.mrb[29].mxu0 }
 0x1cc   :  { %v497_v22 = vadd.f32 %v496_v21, %v3499_v39  ;;  %v498_v23 = vpop.f32.mrb[30].mxu0  ;;  %766 = vmatprep.mubr.bf16.mxu1 %v548_v18 }
 0x1cd   :  { %v531_v24 = vmax.f32 %v495_v20, 0.0  ;;  %v499_v25 = vadd.f32 %v498_v23, %v3496_v38  ;;  %v500_v26 = vpop.f32.mrb[31].mxu0  ;;  %767 = vmatmul.mubr.bf16.gmra.mrb[24].mxu1 %v547_v17  ;;  %v2835_v38 = vpack.c.bf16 %v992_v40, %v991_v36 }
 0x1ce   :  { %v532_v27 = vmax.f32 %v497_v22, 0.0  ;;  %v501_v28 = vadd.f32 %v500_v26, %v3499_v39  ;;  %v3536_v39 = vld [vmem:[%s4017_s10 + $0x2] ss:$0 sm:$0xff]  ;;  %v2847_v22 = vpack.c.bf16 %v998_v14, %v997_v13 }
 0x1cf   :  { %v533_v29 = vmax.f32 %v499_v25, 0.0  ;;  %2836 = vmatprep.subr.bf16.mxu1 %v2835_v38  ;;  %v1000_v25 = vld [vmem:[#allocation8 + $0x48] sm:$0xff] }
 0x1d0   :  { %v534_v30 = vmax.f32 %v501_v28, 0.0 }
 0x1d1   :  { %v549_v31 = vpack.c.bf16 %v533_v29, %v531_v24  ;;  %v999_v24 = vld [vmem:[#allocation8 + $0x40] sm:$0xff] }
 0x1d2   :  { %v550_v32 = vpack.c.bf16 %v534_v30, %v532_v27  ;;  %v2851_v29 = vpack.c.bf16 %v1000_v25, %v999_v24  ;;  %v1001_v30 = vld [vmem:[#allocation8 + $0x50] sm:$0xff]  ;;  %v2479_v25 = vld [vmem:[%s4017_s10 + $0x3] ss:$0 sm:$0xff] }
 0x1d4   :  { %774 = vmatprep.mubr.bf16.mxu1 %v550_v32 }
 0x1d5   :  { %775 = vmatmul.mubr.bf16.gmra.mrb[28].mxu1 %v549_v31  ;;  %v1002_v31 = vld [vmem:[#allocation8 + $0x58] sm:$0xff] }
 0x270   :  { %v2573_v41 = vpop.f32.mrb[0].mxu1 }
 0x271   :  { %v2574_v42 = vpop.f32.mrb[1].mxu1 }
 0x272   :  { %v2575_v43 = vadd.f32 %v2574_v42, %v2573_v41  ;;  %v2576_v44 = vpop.f32.mrb[2].mxu1  ;;  %v2855_v42 = vpack.c.bf16 %v1002_v31, %v1001_v30 }
 0x273   :  { %v2577_v45 = vpop.f32.mrb[3].mxu1 }
 0x274   :  { %v721_v46 = vadd.f32 %v2575_v43, %v3536_v39  ;;  %v2578_v47 = vadd.f32 %v2577_v45, %v2576_v44  ;;  %v1003_v44 = vld [vmem:[#allocation8 + $0x60] sm:$0xff]  ;;  %v1004_v45 = vld [vmem:[#allocation8 + $0x68] sm:$0xff] }
 0x276   :  { %v724_v48 = vadd.f32 %v2578_v47, %v3536_v39  ;;  %v783_v49 = vmax.f32 %v721_v46, 0.0 }
 0x278   :  { %v784_v50 = vmax.f32 %v724_v48, 0.0  ;;  %v2579_v51 = vpop.f32.mrb[4].mxu1 }
 0x279   :  { %v2580_v52 = vpop.f32.mrb[5].mxu1 }
 0x27a   :  { %v2581_v53 = vadd.f32 %v2580_v52, %v2579_v51  ;;  %v2582_v54 = vpop.f32.mrb[6].mxu1  ;;  %v799_v55 = vpack.c.bf16 %v784_v50, %v783_v49  ;;  %v2859_v49 = vpack.c.bf16 %v1004_v45, %v1003_v44 }
 0x27b   :  { %v2583_v56 = vpop.f32.mrb[7].mxu1 }
 0x27c   :  { %v729_v57 = vadd.f32 %v2581_v53, %v3536_v39  ;;  %v2584_v58 = vadd.f32 %v2583_v56, %v2582_v54  ;;  %2711 = vmatprep.mubr.bf16.mxu1 %v799_v55 }
 0x27e   :  { %v732_v59 = vadd.f32 %v2584_v58, %v3536_v39  ;;  %v785_v62 = vmax.f32 %v729_v57, 0.0 }
 0x280   :  { %v786_v63 = vmax.f32 %v732_v59, 0.0  ;;  %v2585_v0 = vpop.f32.mrb[8].mxu1 }
 0x281   :  { %v2586_v1 = vpop.f32.mrb[9].mxu1 }
 0x282   :  { %v800_v2 = vpack.c.bf16 %v786_v63, %v785_v62  ;;  %v2587_v3 = vadd.f32 %v2586_v1, %v2585_v0  ;;  %v2588_v4 = vpop.f32.mrb[10].mxu1 }
 0x283   :  { %v2589_v6 = vpop.f32.mrb[11].mxu1 }
 0x284   :  { %v737_v9 = vadd.f32 %v2587_v3, %v3536_v39  ;;  %v2590_v10 = vadd.f32 %v2589_v6, %v2588_v4  ;;  %2712 = vmatmul.mubr.bf16.vlgmr.msra.gmra.mrb[32].mxu1 %v800_v2 }
 0x285   :  { %2838 = vmatpush3.bf16.msra.mxu1 %v2835_v38 }
 0x286   :  { %v740_v11 = vadd.f32 %v2590_v10, %v3536_v39  ;;  %2840 = vmatprep.subr.bf16.mxu1 %v2839_v5  ;;  %v787_v15 = vmax.f32 %v737_v9, 0.0 }
 0x288   :  { %v788_v16 = vmax.f32 %v740_v11, 0.0  ;;  %v2591_v17 = vpop.f32.mrb[12].mxu1 }
 0x289   :  { %v2592_v18 = vpop.f32.mrb[13].mxu1  ;;  %2842 = vmatpush3.bf16.msra.mxu1 %v2839_v5 }
 0x28a   :  { %v2593_v19 = vadd.f32 %v2592_v18, %v2591_v17  ;;  %v2594_v20 = vpop.f32.mrb[14].mxu1  ;;  %v801_v21 = vpack.c.bf16 %v788_v16, %v787_v15  ;;  %2844 = vmatprep.subr.bf16.mxu1 %v2843_v12 }
 0x28b   :  { %v2595_v23 = vpop.f32.mrb[15].mxu1 }
 0x28c   :  { %v745_v26 = vadd.f32 %v2593_v19, %v3536_v39  ;;  %v2596_v27 = vadd.f32 %v2595_v23, %v2594_v20  ;;  %2715 = vmatprep.mubr.bf16.mxu1 %v801_v21  ;;  %v1006_v23 = vld [vmem:[#allocation8 + $0x78] sm:$0xff] }
 0x28d   :  { %2846 = vmatpush3.bf16.msra.mxu1 %v2843_v12 }
 0x28e   :  { %v748_v28 = vadd.f32 %v2596_v27, %v3536_v39  ;;  %2848 = vmatprep.subr.bf16.mxu1 %v2847_v22  ;;  %v789_v32 = vmax.f32 %v745_v26, 0.0 }
 0x290   :  { %v790_v33 = vmax.f32 %v748_v28, 0.0  ;;  %v2597_v34 = vpop.f32.mrb[16].mxu1 }
 0x291   :  { %v2598_v36 = vpop.f32.mrb[17].mxu1  ;;  %2850 = vmatpush3.bf16.msra.mxu1 %v2847_v22  ;;  %v1005_v22 = vld [vmem:[#allocation8 + $0x70] sm:$0xff] }
 0x292   :  { %v2599_v40 = vadd.f32 %v2598_v36, %v2597_v34  ;;  %v2600_v38 = vpop.f32.mrb[18].mxu1  ;;  %v802_v41 = vpack.c.bf16 %v790_v33, %v789_v32  ;;  %2852 = vmatprep.subr.bf16.mxu1 %v2851_v29  ;;  %v2863_v24 = vpack.c.bf16 %v1006_v23, %v1005_v22 }
 0x293   :  { %v2601_v43 = vpop.f32.mrb[19].mxu1 }
 0x294   :  { %v753_v46 = vadd.f32 %v2599_v40, %v3536_v39  ;;  %v2602_v47 = vadd.f32 %v2601_v43, %v2600_v38  ;;  %2716 = vmatmul.mubr.bf16.gmra.mrb[36].mxu1 %v802_v41 }
 0x295   :  { %2854 = vmatpush3.bf16.msra.mxu1 %v2851_v29 }
 0x296   :  { %v756_v48 = vadd.f32 %v2602_v47, %v3536_v39  ;;  %2856 = vmatprep.subr.bf16.mxu1 %v2855_v42  ;;  %v791_v50 = vmax.f32 %v753_v46, 0.0 }
 0x298   :  { %v792_v51 = vmax.f32 %v756_v48, 0.0  ;;  %v2603_v52 = vpop.f32.mrb[20].mxu1 }
 0x299   :  { %v2604_v53 = vpop.f32.mrb[21].mxu1  ;;  %2858 = vmatpush3.bf16.msra.mxu1 %v2855_v42 }
 0x29a   :  { %v2605_v54 = vadd.f32 %v2604_v53, %v2603_v52  ;;  %v2606_v55 = vpop.f32.mrb[22].mxu1  ;;  %v803_v56 = vpack.c.bf16 %v792_v51, %v791_v50  ;;  %2860 = vmatprep.subr.bf16.mxu1 %v2859_v49 }
 0x29b   :  { %v2607_v57 = vpop.f32.mrb[23].mxu1 }
 0x29c   :  { %v761_v58 = vadd.f32 %v2605_v54, %v3536_v39  ;;  %v2608_v59 = vadd.f32 %v2607_v57, %v2606_v55  ;;  %2719 = vmatprep.mubr.bf16.mxu1 %v803_v56 }
 0x29d   :  { %2862 = vmatpush3.bf16.msra.mxu1 %v2859_v49 }
 0x29e   :  { %v764_v60 = vadd.f32 %v2608_v59, %v3536_v39  ;;  %v793_v61 = vmax.f32 %v761_v58, 0.0  ;;  %2864 = vmatprep.subr.bf16.mxu1 %v2863_v24 }
 0x2a0   :  { %v794_v62 = vmax.f32 %v764_v60, 0.0  ;;  %v2609_v63 = vpop.f32.mrb[24].mxu1 }
 0x2a1   :  { %v2610_v0 = vpop.f32.mrb[25].mxu1  ;;  %2866 = vmatpush3.bf16.msra.mxu1 %v2863_v24 }
 0x2a2   :  { %v2611_v1 = vadd.f32 %v2610_v0, %v2609_v63  ;;  %v2612_v2 = vpop.f32.mrb[26].mxu1  ;;  %v804_v3 = vpack.c.bf16 %v794_v62, %v793_v61 }
 0x2a3   :  { %v2613_v4 = vpop.f32.mrb[27].mxu1 }
 0x2a4   :  { %v769_v5 = vadd.f32 %v2611_v1, %v3536_v39  ;;  %v2614_v6 = vadd.f32 %v2613_v4, %v2612_v2  ;;  %2720 = vmatmul.mubr.bf16.gmra.mrb[40].mxu1 %v804_v3 }
 0x2a6   :  { %v772_v7 = vadd.f32 %v2614_v6, %v3536_v39  ;;  %v795_v8 = vmax.f32 %v769_v5, 0.0 }
 0x2a8   :  { %v796_v9 = vmax.f32 %v772_v7, 0.0  ;;  %v2615_v10 = vpop.f32.mrb[28].mxu1 }
 0x2a9   :  { %v2616_v11 = vpop.f32.mrb[29].mxu1 }
 0x2aa   :  { %v2617_v12 = vadd.f32 %v2616_v11, %v2615_v10  ;;  %v2618_v13 = vpop.f32.mrb[30].mxu1  ;;  %v805_v14 = vpack.c.bf16 %v796_v9, %v795_v8 }
 0x2ab   :  { %v2619_v15 = vpop.f32.mrb[31].mxu1 }
 0x2ac   :  { %v777_v16 = vadd.f32 %v2617_v12, %v3536_v39  ;;  %v2620_v17 = vadd.f32 %v2619_v15, %v2618_v13  ;;  %2723 = vmatprep.mubr.bf16.mxu1 %v805_v14  ;;  %v2955_v12 = vld [vmem:[%s4013_s6] sm:$0xff]   ;;  %v2956_v13 = vld [vmem:[%s4013_s6 + $0x8] sm:$0xff]  }
 0x2ad   :  { %2783 = vmatprep.subr.bf16.mxu1 %v2955_v12  ;;  %v3566_v14 = vld [vmem:[%s4017_s10 + $0x4] ss:$0 sm:$0xff] }
 0x2ae   :  { %v780_v18 = vadd.f32 %v2620_v17, %v3536_v39  ;;  %v797_v19 = vmax.f32 %v777_v16, 0.0 }
 0x2b0   :  { %v798_v20 = vmax.f32 %v780_v18, 0.0 }
 0x2b2   :  { %v806_v21 = vpack.c.bf16 %v798_v20, %v797_v19 }
 0x2b4   :  { %2724 = vmatmul.mubr.bf16.gmra.mrb[44].mxu1 %v806_v21 }
 0x357   :  { %v2713_v26 = vpop.f32.mrb[32].mxu1 }
 0x358   :  { %v912_v27 = vpop.f32.mrb[33].mxu1  ;;  %v921_v30 = vadd.f32 %v2713_v26, %v2479_v25 }
 0x359   :  { %v913_v28 = vadd.f32 %v2479_v25, %v912_v27  ;;  %v2714_v29 = vpop.f32.mrb[34].mxu1 }
 0x35a   :  { %v915_v31 = vpop.f32.mrb[35].mxu1  ;;  %v924_v33 = vadd.f32 %v2714_v29, %v2479_v25  ;;  %v977_v36 = vmax.f32 %v921_v30, 0.0 }
 0x35b   :  { %v975_v39 = vmax.f32 %v913_v28, 0.0  ;;  %v916_v32 = vadd.f32 %v2479_v25, %v915_v31 }
 0x35c   :  { %v978_v40 = vmax.f32 %v924_v33, 0.0 }
 0x35d   :  { %v976_v34 = vmax.f32 %v916_v32, 0.0  ;;  %2759 = vmatprep.mubr.f32.mxu1 %v975_v39 }
 0x35f   :  { %2760 = vmatmul.mubr.f32.vlgmr.msra.gmra.mrb[48].mxu1 %v976_v34 }
 0x360   :  { %2762 = vmatprep.mubr.f32.mxu1 %v977_v36  ;;  %2784 = vmatpush3.bf16.msra.mxu1 %v2955_v12 }
 0x361   :  { %2785 = vmatprep.subr.bf16.mxu1 %v2956_v13 }
 0x363   :  { %2763 = vmatmul.mubr.f32.gmra.mrb[50].mxu1 %v978_v40 }
 0x364   :  { %2786 = vmatpush3.bf16.msra.mxu1 %v2956_v13 }
 0x367   :  { %v2717_v38 = vpop.f32.mrb[36].mxu1 }
 0x368   :  { %v928_v41 = vpop.f32.mrb[37].mxu1  ;;  %v937_v44 = vadd.f32 %v2717_v38, %v2479_v25 }
 0x369   :  { %v929_v42 = vadd.f32 %v2479_v25, %v928_v41  ;;  %v2718_v43 = vpop.f32.mrb[38].mxu1 }
 0x36a   :  { %v931_v45 = vpop.f32.mrb[39].mxu1  ;;  %v940_v48 = vadd.f32 %v2718_v43, %v2479_v25  ;;  %v981_v50 = vmax.f32 %v937_v44, 0.0 }
 0x36b   :  { %v979_v46 = vmax.f32 %v929_v42, 0.0  ;;  %v932_v47 = vadd.f32 %v2479_v25, %v931_v45 }
 0x36c   :  { %v982_v51 = vmax.f32 %v940_v48, 0.0 }
 0x36d   :  { %v980_v49 = vmax.f32 %v932_v47, 0.0  ;;  %2765 = vmatprep.mubr.f32.mxu1 %v979_v46 }
 0x36f   :  { %2766 = vmatmul.mubr.f32.gmra.mrb[52].mxu1 %v980_v49 }
 0x370   :  { %2768 = vmatprep.mubr.f32.mxu1 %v981_v50 }
 0x373   :  { %2769 = vmatmul.mubr.f32.gmra.mrb[54].mxu1 %v982_v51 }
 0x377   :  { %v2721_v52 = vpop.f32.mrb[40].mxu1 }
 0x378   :  { %v944_v53 = vpop.f32.mrb[41].mxu1  ;;  %v953_v56 = vadd.f32 %v2721_v52, %v2479_v25 }
 0x379   :  { %v945_v54 = vadd.f32 %v2479_v25, %v944_v53  ;;  %v2722_v55 = vpop.f32.mrb[42].mxu1 }
 0x37a   :  { %v947_v57 = vpop.f32.mrb[43].mxu1  ;;  %v956_v60 = vadd.f32 %v2722_v55, %v2479_v25  ;;  %v985_v62 = vmax.f32 %v953_v56, 0.0 }
 0x37b   :  { %v983_v58 = vmax.f32 %v945_v54, 0.0  ;;  %v948_v59 = vadd.f32 %v2479_v25, %v947_v57 }
 0x37c   :  { %v986_v63 = vmax.f32 %v956_v60, 0.0 }
 0x37d   :  { %v984_v61 = vmax.f32 %v948_v59, 0.0  ;;  %2771 = vmatprep.mubr.f32.mxu1 %v983_v58 }
 0x37f   :  { %2772 = vmatmul.mubr.f32.gmra.mrb[56].mxu1 %v984_v61 }
 0x380   :  { %2774 = vmatprep.mubr.f32.mxu1 %v985_v62 }
 0x383   :  { %2775 = vmatmul.mubr.f32.gmra.mrb[58].mxu1 %v986_v63 }
 0x387   :  { %v2725_v0 = vpop.f32.mrb[44].mxu1 }
 0x388   :  { %v960_v1 = vpop.f32.mrb[45].mxu1  ;;  %v969_v4 = vadd.f32 %v2725_v0, %v2479_v25 }
 0x389   :  { %v961_v2 = vadd.f32 %v2479_v25, %v960_v1  ;;  %v2726_v3 = vpop.f32.mrb[46].mxu1 }
 0x38a   :  { %v963_v5 = vpop.f32.mrb[47].mxu1  ;;  %v972_v8 = vadd.f32 %v2726_v3, %v2479_v25  ;;  %v989_v10 = vmax.f32 %v969_v4, 0.0 }
 0x38b   :  { %v987_v6 = vmax.f32 %v961_v2, 0.0  ;;  %v964_v7 = vadd.f32 %v2479_v25, %v963_v5 }
 0x38c   :  { %v990_v11 = vmax.f32 %v972_v8, 0.0 }
 0x38d   :  { %v988_v9 = vmax.f32 %v964_v7, 0.0  ;;  %2777 = vmatprep.mubr.f32.mxu1 %v987_v6 }
 0x38f   :  { %2778 = vmatmul.mubr.f32.gmra.mrb[60].mxu1 %v988_v9 }
 0x390   :  { %2780 = vmatprep.mubr.f32.mxu1 %v989_v10 }
 0x393   :  { %2781 = vmatmul.mubr.f32.gmra.mrb[62].mxu1 %v990_v11 }
 0x432   :  { %v2761_v15 = vpop.f32.mrb[48].mxu1 }
 0x433   :  { %v3569_v16 = vadd.f32 %v2761_v15, %v3566_v14  ;;  %v1080_v17 = vpop.f32.mrb[49].mxu1 }
 0x434   :  { %v3572_v18 = vadd.f32 %v3566_v14, %v1080_v17 }
 0x435   :  { %v1176_v19 = vmul.f32 0.5, %v3569_v16  ;;  %2307 = vst.msk [vmem:[%s4019_s12 + $0x8] sm:$0xff] %vm1350_vm0, %v3569_v16 }
 0x436   :  { %v1175_v20 = vmul.f32 0.5, %v3572_v18  ;;  %2306 = vst.msk [vmem:[%s4019_s12] sm:$0xff] %vm1350_vm0, %v3572_v18  ;;  %v2764_v21 = vpop.f32.mrb[50].mxu1 }
 0x437   :  { %v3587_v22 = vadd.f32 %v2764_v21, %v3566_v14  ;;  %v1090_v23 = vpop.f32.mrb[51].mxu1  ;;  %v1193_v26 = vmul.f32 1.442695, %v1176_v19 }
 0x438   :  { %v1191_v24 = vmul.f32 1.442695, %v1175_v20  ;;  %v3590_v25 = vadd.f32 %v3566_v14, %v1090_v23 }
 0x439   :  { %2309 = vst.msk [vmem:[%s4019_s12 + $0x18] sm:$0xff] %vm1350_vm0, %v3587_v22  ;;  %v1178_v27 = vmul.f32 0.5, %v3587_v22 }
 0x43a   :  { %3037 = vpow2.f32 %v1191_v24  ;;  %v1177_v28 = vmul.f32 0.5, %v3590_v25  ;;  %2308 = vst.msk [vmem:[%s4019_s12 + $0x10] sm:$0xff] %vm1350_vm0, %v3590_v25 }
 0x43b   :  { %3039 = vpow2.f32 %v1193_v26  ;;  %v1197_v30 = vmul.f32 1.442695, %v1178_v27 }
 0x43c   :  { %v1195_v29 = vmul.f32 1.442695, %v1177_v28 }
 0x43e   :  { %3041 = vpow2.f32 %v1195_v29 }
 0x43f   :  { %3043 = vpow2.f32 %v1197_v30 }
 0x442   :  { %v2767_v31 = vpop.f32.mrb[52].mxu1 }
 0x443   :  { %v3605_v39 = vadd.f32 %v2767_v31, %v3566_v14  ;;  %v1100_v32 = vpop.f32.mrb[53].mxu1 }
 0x444   :  { %v3038_v33 = vpop.eup %3037  ;;  %v3608_v34 = vadd.f32 %v3566_v14, %v1100_v32 }
 0x445   :  { %v1180_v36 = vmul.f32 0.5, %v3605_v39  ;;  %2311 = vst.msk [vmem:[%s4019_s12 + $0x28] sm:$0xff] %vm1350_vm0, %v3605_v39  ;;  %1239 = vrot.lane.b32.xlu0 %v3038_v33, %s3268_s17  ;;  %v3040_v41 = vpop.eup %3039 }
 0x446   :  { %v1179_v40 = vmul.f32 0.5, %v3608_v34  ;;  %2310 = vst.msk [vmem:[%s4019_s12 + $0x20] sm:$0xff] %vm1350_vm0, %v3608_v34  ;;  %v2770_v38 = vpop.f32.mrb[54].mxu1 }
 0x447   :  { %v1201_v42 = vmul.f32 1.442695, %v1180_v36  ;;  %v3624_v43 = vadd.f32 %v2770_v38, %v3566_v14  ;;  %v1110_v44 = vpop.f32.mrb[55].mxu1 }
 0x448   :  { %v3042_v45 = vpop.eup %3041  ;;  %v1199_v46 = vmul.f32 1.442695, %v1179_v40  ;;  %v3627_v47 = vadd.f32 %v3566_v14, %v1110_v44  ;;  %v2959_v44 = vld [vmem:[#allocation10 + $0x10] sm:$0xff]  }
 0x449   :  { %3045 = vpow2.f32 %v1201_v42  ;;  %v1182_v48 = vmul.f32 0.5, %v3624_v43  ;;  %2313 = vst.msk [vmem:[%s4019_s12 + $0x38] sm:$0xff] %vm1350_vm0, %v3624_v43  ;;  %1243 = vrot.lane.b32.xlu1 %v3042_v45, %s3268_s17  ;;  %1241 = vrot.lane.b32.xlu0 %v3040_v41, %s3268_s17  ;;  %v3044_v51 = vpop.eup %3043  ;;  %v2957_v41 = vld [vmem:[#allocation10] sm:$0xff]   ;;  %v2958_v42 = vld [vmem:[#allocation10 + $0x8] sm:$0xff]   ;;  %v2960_v45 = vld [vmem:[#allocation10 + $0x18] sm:$0xff]  }
 0x44a   :  { %3047 = vpow2.f32 %v1199_v46  ;;  %v1181_v49 = vmul.f32 0.5, %v3627_v47  ;;  %2312 = vst.msk [vmem:[%s4019_s12 + $0x30] sm:$0xff] %vm1350_vm0, %v3627_v47  ;;  %2803 = vmatprep.subr.bf16.mxu0 %v2957_v41  ;;  %v2961_v46 = vld [vmem:[#allocation10 + $0x20] sm:$0xff]  }
 0x44b   :  { %v1205_v50 = vmul.f32 1.442695, %v1182_v48  ;;  %2804 = vmatpush3.bf16.msra.mxu0 %v2957_v41  ;;  %v2962_v48 = vld [vmem:[#allocation10 + $0x28] sm:$0xff]  }
 0x44c   :  { %v1203_v52 = vmul.f32 1.442695, %v1181_v49  ;;  %2805 = vmatprep.subr.bf16.mxu0 %v2958_v42  ;;  %v2963_v49 = vld [vmem:[#allocation10 + $0x30] sm:$0xff]  }
 0x44d   :  { %3049 = vpow2.f32 %v1205_v50  ;;  %1245 = vrot.lane.b32.xlu1 %v3044_v51, %s3268_s17  ;;  %v1159_v50 = vld [vmem:[%s4008_s1] sm:$0xff] }
 0x44e   :  { %3051 = vpow2.f32 %v1203_v52  ;;  %v1160_v52 = vld [vmem:[%s4008_s1 + $0x8] sm:$0xff] }
 0x44f   :  { %2806 = vmatpush3.bf16.msra.mxu0 %v2958_v42 }
 0x450   :  { %2807 = vmatprep.subr.bf16.mxu0 %v2959_v44 }
 0x452   :  { %v2773_v53 = vpop.f32.mrb[56].mxu1 }
 0x453   :  { %v3046_v54 = vpop.eup %3045  ;;  %v3645_v55 = vadd.f32 %v2773_v53, %v3566_v14  ;;  %v1120_v56 = vpop.f32.mrb[57].mxu1  ;;  %2808 = vmatpush3.bf16.msra.mxu0 %v2959_v44 }
 0x454   :  { %v3048_v57 = vpop.eup %3047  ;;  %v3648_v58 = vadd.f32 %v3566_v14, %v1120_v56  ;;  %1249 = vrot.lane.b32.xlu1 %v3046_v54, %s3268_s17  ;;  %2809 = vmatprep.subr.bf16.mxu0 %v2960_v45  ;;  %v1161_v54 = vld [vmem:[%s4008_s1 + $0x10] sm:$0xff] }
 0x455   :  { %v1184_v59 = vmul.f32 0.5, %v3645_v55  ;;  %2315 = vst.msk [vmem:[%s4019_s12 + $0x48] sm:$0xff] %vm1350_vm0, %v3645_v55  ;;  %1247 = vrot.lane.b32.xlu0 %v3048_v57, %s3268_s17 }
 0x456   :  { %v1183_v60 = vmul.f32 0.5, %v3648_v58  ;;  %2314 = vst.msk [vmem:[%s4019_s12 + $0x40] sm:$0xff] %vm1350_vm0, %v3648_v58  ;;  %v2776_v61 = vpop.f32.mrb[58].mxu1 }
 0x457   :  { %v3050_v62 = vpop.eup %3049  ;;  %v1209_v63 = vmul.f32 1.442695, %v1184_v59  ;;  %v3665_v0 = vadd.f32 %v2776_v61, %v3566_v14  ;;  %v1130_v1 = vpop.f32.mrb[59].mxu1  ;;  %2810 = vmatpush3.bf16.msra.mxu0 %v2960_v45 }
 0x458   :  { %v3052_v2 = vpop.eup %3051  ;;  %v1207_v3 = vmul.f32 1.442695, %v1183_v60  ;;  %v3668_v4 = vadd.f32 %v3566_v14, %v1130_v1  ;;  %1253 = vrot.lane.b32.xlu1 %v3050_v62, %s3268_s17  ;;  %2811 = vmatprep.subr.bf16.mxu0 %v2961_v46  ;;  %v1162_v60 = vld [vmem:[%s4008_s1 + $0x18] sm:$0xff] }
 0x459   :  { %3053 = vpow2.f32 %v1209_v63  ;;  %v1186_v5 = vmul.f32 0.5, %v3665_v0  ;;  %2317 = vst.msk [vmem:[%s4019_s12 + $0x58] sm:$0xff] %vm1350_vm0, %v3665_v0  ;;  %1251 = vrot.lane.b32.xlu0 %v3052_v2, %s3268_s17 }
 0x45a   :  { %3055 = vpow2.f32 %v1207_v3  ;;  %v1185_v6 = vmul.f32 0.5, %v3668_v4  ;;  %2316 = vst.msk [vmem:[%s4019_s12 + $0x50] sm:$0xff] %vm1350_vm0, %v3668_v4 }
 0x45b   :  { %v1213_v7 = vmul.f32 1.442695, %v1186_v5  ;;  %2812 = vmatpush3.bf16.msra.mxu0 %v2961_v46 }
 0x45c   :  { %v1211_v8 = vmul.f32 1.442695, %v1185_v6  ;;  %2813 = vmatprep.subr.bf16.mxu0 %v2962_v48 }
 0x45d   :  { %3057 = vpow2.f32 %v1213_v7 }
 0x45e   :  { %3059 = vpow2.f32 %v1211_v8  ;;  %v1164_v8 = vld [vmem:[%s4008_s1 + $0x28] sm:$0xff] }
 0x45f   :  { %2814 = vmatpush3.bf16.msra.mxu0 %v2962_v48 }
 0x460   :  { %2815 = vmatprep.subr.bf16.mxu0 %v2963_v49 }
 0x462   :  { %v2779_v9 = vpop.f32.mrb[60].mxu1 }
 0x463   :  { %v3054_v10 = vpop.eup %3053  ;;  %v3685_v11 = vadd.f32 %v2779_v9, %v3566_v14  ;;  %v1140_v12 = vpop.f32.mrb[61].mxu1  ;;  %2816 = vmatpush3.bf16.msra.mxu0 %v2963_v49 }
 0x464   :  { %v3056_v13 = vpop.eup %3055  ;;  %v3688_v15 = vadd.f32 %v3566_v14, %v1140_v12  ;;  %1257 = vrot.lane.b32.xlu1 %v3054_v10, %s3268_s17 }
 0x465   :  { %v1188_v17 = vmul.f32 0.5, %v3685_v11  ;;  %2319 = vst.msk [vmem:[%s4019_s12 + $0x68] sm:$0xff] %vm1350_vm0, %v3685_v11  ;;  %1255 = vrot.lane.b32.xlu0 %v3056_v13, %s3268_s17  ;;  %v1165_v13 = vld [vmem:[%s4008_s1 + $0x30] sm:$0xff] }
 0x466   :  { %v1187_v19 = vmul.f32 0.5, %v3688_v15  ;;  %2318 = vst.msk [vmem:[%s4019_s12 + $0x60] sm:$0xff] %vm1350_vm0, %v3688_v15  ;;  %v2782_v20 = vpop.f32.mrb[62].mxu1 }
 0x467   :  { %v3058_v21 = vpop.eup %3057  ;;  %v1217_v23 = vmul.f32 1.442695, %v1188_v17  ;;  %v3705_v24 = vadd.f32 %v2782_v20, %v3566_v14  ;;  %v1150_v26 = vpop.f32.mrb[63].mxu1 }
 0x468   :  { %v3060_v27 = vpop.eup %3059  ;;  %v1215_v28 = vmul.f32 1.442695, %v1187_v19  ;;  %v3708_v29 = vadd.f32 %v3566_v14, %v1150_v26  ;;  %1261 = vrot.lane.b32.xlu1 %v3058_v21, %s3268_s17 }
 0x469   :  { %3061 = vpow2.f32 %v1217_v23  ;;  %v1190_v30 = vmul.f32 0.5, %v3705_v24  ;;  %2321 = vst.msk [vmem:[%s4019_s12 + $0x78] sm:$0xff] %vm1350_vm0, %v3705_v24  ;;  %1259 = vrot.lane.b32.xlu0 %v3060_v27, %s3268_s17 }
 0x46a   :  { %3063 = vpow2.f32 %v1215_v28  ;;  %v1189_v31 = vmul.f32 0.5, %v3708_v29  ;;  %2320 = vst.msk [vmem:[%s4019_s12 + $0x70] sm:$0xff] %vm1350_vm0, %v3708_v29 }
 0x46b   :  { %v1221_v14 = vmul.f32 1.442695, %v1190_v30 }
 0x46c   :  { %v1219_v32 = vmul.f32 1.442695, %v1189_v31 }
 0x46d   :  { %3065 = vpow2.f32 %v1221_v14 }
 0x46e   :  { %3067 = vpow2.f32 %v1219_v32 }
 0x473   :  { %v3062_v33 = vpop.eup %3061 }
 0x474   :  { %v3064_v36 = vpop.eup %3063  ;;  %1265 = vrot.lane.b32.xlu1 %v3062_v33, %s3268_s17 }
 0x475   :  { %1263 = vrot.lane.b32.xlu0 %v3064_v36, %s3268_s17  ;;  %v1169_v36 = vld [vmem:[%s4008_s1 + $0x50] sm:$0xff] }
 0x477   :  { %v3066_v40 = vpop.eup %3065 }
 0x478   :  { %v3068_v38 = vpop.eup %3067  ;;  %1269 = vrot.lane.b32.xlu1 %v3066_v40, %s3268_s17 }
 0x479   :  { %1267 = vrot.lane.b32.xlu0 %v3068_v38, %s3268_s17 }
 0x47c   :  { %2340 = vrot.lane.b32.xlu1 %v3569_v16, %s3268_s17 }
 0x47d   :  { %2338 = vrot.lane.b32.xlu0 %v3572_v18, %s3268_s17 }
 0x480   :  { %2344 = vrot.lane.b32.xlu1 %v3587_v22, %s3268_s17 }
 0x481   :  { %2342 = vrot.lane.b32.xlu0 %v3590_v25, %s3268_s17 }
 0x484   :  { %2348 = vrot.lane.b32.xlu1 %v3605_v39, %s3268_s17 }
 0x485   :  { %2346 = vrot.lane.b32.xlu0 %v3608_v34, %s3268_s17 }
 0x488   :  { %2352 = vrot.lane.b32.xlu1 %v3624_v43, %s3268_s17 }
 0x489   :  { %2350 = vrot.lane.b32.xlu0 %v3627_v47, %s3268_s17 }
 0x48c   :  { %2356 = vrot.lane.b32.xlu1 %v3645_v55, %s3268_s17 }
 0x48d   :  { %2354 = vrot.lane.b32.xlu0 %v3648_v58, %s3268_s17 }
 0x490   :  { %2360 = vrot.lane.b32.xlu1 %v3665_v0, %s3268_s17 }
 0x491   :  { %2358 = vrot.lane.b32.xlu0 %v3668_v4, %s3268_s17 }
 0x494   :  { %2364 = vrot.lane.b32.xlu1 %v3685_v11, %s3268_s17 }
 0x495   :  { %2362 = vrot.lane.b32.xlu0 %v3688_v15, %s3268_s17 }
 0x498   :  { %2368 = vrot.lane.b32.xlu1 %v3705_v24, %s3268_s17 }
 0x499   :  { %2366 = vrot.lane.b32.xlu0 %v3708_v29, %s3268_s17 }
 0x4b7   :  { %v1240_v51 = vpop.permute.xlu0 %1239 }
 0x4b8   :  { %v1287_v53 = vmul.f32 %v1240_v51, %v1159_v50 }
 0x4ba   :  { %v1303_v61 = vadd.f32 %v1287_v53, %v3572_v18  ;;  %v1163_v18 = vld [vmem:[%s4008_s1 + $0x20] sm:$0xff] }
 0x4bb   :  { %v1244_v56 = vpop.permute.xlu1 %1243  ;;  %v1242_v57 = vpop.permute.xlu0 %1241 }
 0x4bc   :  { %v1288_v59 = vmul.f32 %v1242_v57, %v1160_v52  ;;  %v1289_v62 = vmul.f32 %v1244_v56, %v1161_v54  ;;  %v1173_v54 = vld [vmem:[%s4008_s1 + $0x70] sm:$0xff] }
 0x4be   :  { %v1304_v63 = vadd.f32 %v1288_v59, %v3569_v16  ;;  %v1305_v5 = vadd.f32 %v1289_v62, %v3590_v25 }
 0x4bf   :  { %v1246_v1 = vpop.permute.xlu1 %1245 }
 0x4c0   :  { %v1319_v2 = vpack.c.bf16 %v1304_v63, %v1303_v61  ;;  %v1290_v3 = vmul.f32 %v1246_v1, %v1162_v60 }
 0x4c2   :  { %v1306_v6 = vadd.f32 %v1290_v3, %v3587_v22  ;;  %2787 = vmatprep.mubr.msk.bf16.mxu1 %vm1350_vm0, %v1319_v2  ;;  %v1166_v22 = vld [vmem:[%s4008_s1 + $0x38] sm:$0xff] }
 0x4c4   :  { %v1320_v7 = vpack.c.bf16 %v1306_v6, %v1305_v5 }
 0x4c6   :  { %v1250_v9 = vpop.permute.xlu1 %1249  ;;  %2788 = vmatmul.mubr.msk.bf16.vlgmr.msra.gmra.mrb[64].mxu1 %vm1350_vm0, %v1320_v7 }
 0x4c7   :  { %v1292_v16 = vmul.f32 %v1250_v9, %v1164_v8  ;;  %v1248_v10 = vpop.permute.xlu0 %1247 }
 0x4c8   :  { %v1291_v12 = vmul.f32 %v1248_v10, %v1163_v18 }
 0x4c9   :  { %v1308_v25 = vadd.f32 %v1292_v16, %v3605_v39  ;;  %v1168_v39 = vld [vmem:[%s4008_s1 + $0x48] sm:$0xff] }
 0x4ca   :  { %v1307_v17 = vadd.f32 %v1291_v12, %v3608_v34  ;;  %v1254_v19 = vpop.permute.xlu1 %1253  ;;  %v1167_v34 = vld [vmem:[%s4008_s1 + $0x40] sm:$0xff] }
 0x4cb   :  { %v1294_v20 = vmul.f32 %v1254_v19, %v1166_v22  ;;  %v1252_v21 = vpop.permute.xlu0 %1251  ;;  %v2967_v19 = vld [vmem:[#allocation11 + $0x4] ss:$8 sps:$4 sm:$0xff]  }
 0x4cc   :  { %v1321_v23 = vpack.c.bf16 %v1308_v25, %v1307_v17  ;;  %v1293_v26 = vmul.f32 %v1252_v21, %v1165_v13  ;;  %v2964_v13 = vld [vmem:[#allocation10 + $0x38] sm:$0xff]   ;;  %v2965_v17 = vld [vmem:[#allocation11] ss:$8 sps:$4 sm:$0xff]   ;;  %1796 = vmatprep.subr.bf16.mxu1 %v2967_v19 }
 0x4cd   :  { %v1310_v27 = vadd.f32 %v1294_v20, %v3624_v43  ;;  %v1170_v43 = vld [vmem:[%s4008_s1 + $0x58] sm:$0xff]  ;;  %2817 = vmatprep.subr.bf16.mxu0 %v2964_v13  ;;  %1797 = vmatpush1.bf16.msra.mxu1 %v2965_v17 }
 0x4ce   :  { %v1309_v28 = vadd.f32 %v1293_v26, %v3627_v47  ;;  %2791 = vmatprep.mubr.msk.bf16.mxu1 %vm1350_vm0, %v1321_v23  ;;  %2818 = vmatpush3.bf16.msra.mxu0 %v2964_v13  ;;  %v2970_v20 = vld [vmem:[#allocation11 + $0x14] ss:$8 sps:$4 sm:$0xff]   ;;  %v2968_v21 = vld [vmem:[#allocation11 + $0x10] ss:$8 sps:$4 sm:$0xff]   ;;  %v2973_v23 = vld [vmem:[#allocation11 + $0x24] ss:$8 sps:$4 sm:$0xff]  }
 0x4cf   :  { %1798 = vmatprep.subr.bf16.mxu1 %v2970_v20  ;;  %v2971_v26 = vld [vmem:[#allocation11 + $0x20] ss:$8 sps:$4 sm:$0xff]  }
 0x4d0   :  { %v1322_v30 = vpack.c.bf16 %v1310_v27, %v1309_v28  ;;  %v2976_v27 = vld [vmem:[#allocation11 + $0x34] ss:$8 sps:$4 sm:$0xff]   ;;  %v2974_v28 = vld [vmem:[#allocation11 + $0x30] ss:$8 sps:$4 sm:$0xff]  }
 0x4d1   :  { %1799 = vmatpush1.bf16.msra.mxu1 %v2968_v21 }
 0x4d2   :  { %2792 = vmatmul.mubr.msk.bf16.gmra.mrb[68].mxu1 %vm1350_vm0, %v1322_v30  ;;  %1800 = vmatprep.subr.bf16.mxu1 %v2973_v23  ;;  %v2979_v30 = vld [vmem:[#allocation11 + $0x44] ss:$8 sps:$4 sm:$0xff]  }
 0x4d5   :  { %1801 = vmatpush1.bf16.msra.mxu1 %v2971_v26 }
 0x4d6   :  { %v1258_v31 = vpop.permute.xlu1 %1257  ;;  %1802 = vmatprep.subr.bf16.mxu1 %v2976_v27 }
 0x4d7   :  { %v1296_v14 = vmul.f32 %v1258_v31, %v1168_v39  ;;  %v1256_v32 = vpop.permute.xlu0 %1255  ;;  %v2977_v39 = vld [vmem:[#allocation11 + $0x40] ss:$8 sps:$4 sm:$0xff]   ;;  %v2980_v31 = vld [vmem:[#allocation11 + $0x50] ss:$8 sps:$4 sm:$0xff]  }
 0x4d8   :  { %v1295_v33 = vmul.f32 %v1256_v32, %v1167_v34  ;;  %v2982_v34 = vld [vmem:[#allocation11 + $0x54] ss:$8 sps:$4 sm:$0xff]  }
 0x4d9   :  { %v1312_v47 = vadd.f32 %v1296_v14, %v3645_v55  ;;  %v1172_v55 = vld [vmem:[%s4008_s1 + $0x68] sm:$0xff]  ;;  %1803 = vmatpush1.bf16.msra.mxu1 %v2974_v28  ;;  %v2489_v14 = vld [vmem:[%s4017_s10 + $0x5] ss:$0 sm:$0xff] }
 0x4da   :  { %v1311_v40 = vadd.f32 %v1295_v33, %v3648_v58  ;;  %v1262_v38 = vpop.permute.xlu1 %1261  ;;  %v1171_v58 = vld [vmem:[%s4008_s1 + $0x60] sm:$0xff]  ;;  %1804 = vmatprep.subr.bf16.mxu1 %v2979_v30 }
 0x4db   :  { %v1298_v41 = vmul.f32 %v1262_v38, %v1170_v43  ;;  %v1260_v42 = vpop.permute.xlu0 %1259  ;;  %v2985_v28 = vld [vmem:[#allocation11 + $0x64] ss:$8 sps:$4 sm:$0xff]   ;;  %v2983_v30 = vld [vmem:[#allocation11 + $0x60] ss:$8 sps:$4 sm:$0xff]  }
 0x4dc   :  { %v1323_v44 = vpack.c.bf16 %v1312_v47, %v1311_v40  ;;  %v1297_v45 = vmul.f32 %v1260_v42, %v1169_v36 }
 0x4dd   :  { %v1314_v46 = vadd.f32 %v1298_v41, %v3665_v0  ;;  %v1174_v0 = vld [vmem:[%s4008_s1 + $0x78] sm:$0xff]  ;;  %1805 = vmatpush1.bf16.msra.mxu1 %v2977_v39 }
 0x4de   :  { %v1313_v48 = vadd.f32 %v1297_v45, %v3668_v4  ;;  %2795 = vmatprep.mubr.msk.bf16.mxu1 %vm1350_vm0, %v1323_v44  ;;  %1806 = vmatprep.subr.bf16.mxu1 %v2982_v34  ;;  %v2988_v39 = vld [vmem:[#allocation11 + $0x74] ss:$8 sps:$4 sm:$0xff]   ;;  %v2986_v34 = vld [vmem:[#allocation11 + $0x70] ss:$8 sps:$4 sm:$0xff]  }
 0x4e0   :  { %v1324_v49 = vpack.c.bf16 %v1314_v46, %v1313_v48 }
 0x4e1   :  { %1807 = vmatpush1.bf16.msra.mxu1 %v2980_v31  ;;  %v3269_v31 = vmov 0  }
 0x4e2   :  { %2796 = vmatmul.mubr.msk.bf16.gmra.mrb[72].mxu1 %vm1350_vm0, %v1324_v49  ;;  %1808 = vmatprep.subr.bf16.mxu1 %v2985_v28 }
 0x4e5   :  { %1809 = vmatpush1.bf16.msra.mxu1 %v2983_v30 }
 0x4e6   :  { %v1266_v50 = vpop.permute.xlu1 %1265  ;;  %1810 = vmatprep.subr.bf16.mxu1 %v2988_v39 }
 0x4e7   :  { %v1300_v51 = vmul.f32 %v1266_v50, %v1172_v55  ;;  %v1264_v52 = vpop.permute.xlu0 %1263 }
 0x4e8   :  { %v1299_v53 = vmul.f32 %v1264_v52, %v1171_v58 }
 0x4e9   :  { %v1316_v4 = vadd.f32 %v1300_v51, %v3685_v11  ;;  %1811 = vmatpush1.bf16.msra.mxu1 %v2986_v34 }
 0x4ea   :  { %v1315_v56 = vadd.f32 %v1299_v53, %v3688_v15  ;;  %v1270_v57 = vpop.permute.xlu1 %1269 }
 0x4eb   :  { %v1302_v59 = vmul.f32 %v1270_v57, %v1174_v0  ;;  %v1268_v60 = vpop.permute.xlu0 %1267 }
 0x4ec   :  { %v1325_v61 = vpack.c.bf16 %v1316_v4, %v1315_v56  ;;  %v1301_v62 = vmul.f32 %v1268_v60, %v1173_v54 }
 0x4ed   :  { %v1318_v63 = vadd.f32 %v1302_v59, %v3705_v24 }
 0x4ee   :  { %v1317_v1 = vadd.f32 %v1301_v62, %v3708_v29  ;;  %v2341_v2 = vpop.permute.xlu1 %2340  ;;  %2799 = vmatprep.mubr.msk.bf16.mxu1 %vm1350_vm0, %v1325_v61 }
 0x4ef   :  { %2387 = vst.msk [vmem:[%s4020_s13 + $0x8] sm:$0xff] %vm1350_vm0, %v2341_v2  ;;  %v2339_v11 = vpop.permute.xlu0 %2338 }
 0x4f0   :  { %v1326_v3 = vpack.c.bf16 %v1318_v63, %v1317_v1  ;;  %2386 = vst.msk [vmem:[%s4020_s13] sm:$0xff] %vm1350_vm0, %v2339_v11 }
 0x4f2   :  { %v2345_v15 = vpop.permute.xlu1 %2344  ;;  %2800 = vmatmul.mubr.msk.bf16.gmra.mrb[76].mxu1 %vm1350_vm0, %v1326_v3 }
 0x4f3   :  { %2389 = vst.msk [vmem:[%s4020_s13 + $0x18] sm:$0xff] %vm1350_vm0, %v2345_v15  ;;  %v2343_v24 = vpop.permute.xlu0 %2342  ;;  %1828 = vmatprep.mubr.bf16.mxu1 %v3269_v31 }
 0x4f4   :  { %2388 = vst.msk [vmem:[%s4020_s13 + $0x10] sm:$0xff] %vm1350_vm0, %v2343_v24 }
 0x4f6   :  { %v2349_v29 = vpop.permute.xlu1 %2348 }
 0x4f7   :  { %2391 = vst.msk [vmem:[%s4020_s13 + $0x28] sm:$0xff] %vm1350_vm0, %v2349_v29  ;;  %v2347_v5 = vpop.permute.xlu0 %2346 }
 0x4f8   :  { %2390 = vst.msk [vmem:[%s4020_s13 + $0x20] sm:$0xff] %vm1350_vm0, %v2347_v5 }
 0x4fa   :  { %v2353_v6 = vpop.permute.xlu1 %2352 }
 0x4fb   :  { %2393 = vst.msk [vmem:[%s4020_s13 + $0x38] sm:$0xff] %vm1350_vm0, %v2353_v6  ;;  %v2351_v7 = vpop.permute.xlu0 %2350 }
 0x4fc   :  { %2392 = vst.msk [vmem:[%s4020_s13 + $0x30] sm:$0xff] %vm1350_vm0, %v2351_v7 }
 0x4fe   :  { %v2357_v8 = vpop.permute.xlu1 %2356 }
 0x4ff   :  { %2395 = vst.msk [vmem:[%s4020_s13 + $0x48] sm:$0xff] %vm1350_vm0, %v2357_v8  ;;  %v2355_v18 = vpop.permute.xlu0 %2354 }
 0x500   :  { %2394 = vst.msk [vmem:[%s4020_s13 + $0x40] sm:$0xff] %vm1350_vm0, %v2355_v18 }
 0x502   :  { %v2361_v9 = vpop.permute.xlu1 %2360 }
 0x503   :  { %2397 = vst.msk [vmem:[%s4020_s13 + $0x58] sm:$0xff] %vm1350_vm0, %v2361_v9  ;;  %v2359_v16 = vpop.permute.xlu0 %2358 }
 0x504   :  { %2396 = vst.msk [vmem:[%s4020_s13 + $0x50] sm:$0xff] %vm1350_vm0, %v2359_v16 }
 0x506   :  { %v2365_v10 = vpop.permute.xlu1 %2364 }
 0x507   :  { %2399 = vst.msk [vmem:[%s4020_s13 + $0x68] sm:$0xff] %vm1350_vm0, %v2365_v10  ;;  %v2363_v12 = vpop.permute.xlu0 %2362 }
 0x508   :  { %2398 = vst.msk [vmem:[%s4020_s13 + $0x60] sm:$0xff] %vm1350_vm0, %v2363_v12 }
 0x50a   :  { %v2369_v22 = vpop.permute.xlu1 %2368 }
 0x50b   :  { %2401 = vst.msk [vmem:[%s4020_s13 + $0x78] sm:$0xff] %vm1350_vm0, %v2369_v22  ;;  %v2367_v25 = vpop.permute.xlu0 %2366 }
 0x50c   :  { %2400 = vst.msk [vmem:[%s4020_s13 + $0x70] sm:$0xff] %vm1350_vm0, %v2367_v25 }
 0x599   :  { %v2789_v32 = vpop.f32.mrb[64].mxu1 }
 0x59a   :  { %v1418_v33 = vadd.f32 %v2789_v32, %v2489_v14  ;;  %v1409_v43 = vpop.f32.mrb[65].mxu1  ;;  %v2991_v32 = vld [vmem:[#allocation13 + $0x4] ss:$8 sps:$4 sm:$0xff]  }
 0x59b   :  { %v1410_v47 = vadd.f32 %v2489_v14, %v1409_v43  ;;  %v2790_v36 = vpop.f32.mrb[66].mxu1  ;;  %2161 = vmatprep.subr.bf16.mxu0 %v2991_v32  ;;  %v2992_v43 = vld [vmem:[#allocation13 + $0x10] ss:$8 sps:$4 sm:$0xff]  }
 0x59c   :  { %v1421_v40 = vadd.f32 %v2790_v36, %v2489_v14  ;;  %v1412_v38 = vpop.f32.mrb[67].mxu1  ;;  %v1474_v42 = vmax.f32 %v1418_v33, 0.0  ;;  %v2994_v33 = vld [vmem:[#allocation13 + $0x14] ss:$8 sps:$4 sm:$0xff]   ;;  %v2995_v36 = vld [vmem:[#allocation13 + $0x20] ss:$8 sps:$4 sm:$0xff]  }
 0x59d   :  { %v1413_v41 = vadd.f32 %v2489_v14, %v1412_v38  ;;  %v1472_v45 = vmax.f32 %v1410_v47, 0.0  ;;  %v2997_v47 = vld [vmem:[#allocation13 + $0x24] ss:$8 sps:$4 sm:$0xff]   ;;  %v2998_v38 = vld [vmem:[#allocation13 + $0x30] ss:$8 sps:$4 sm:$0xff]  }
 0x59e   :  { %v1475_v44 = vmax.f32 %v1421_v40, 0.0  ;;  %v3000_v40 = vld [vmem:[#allocation13 + $0x34] ss:$8 sps:$4 sm:$0xff]  }
 0x59f   :  { %v1473_v46 = vmax.f32 %v1413_v41, 0.0  ;;  %v3003_v41 = vld [vmem:[#allocation13 + $0x44] ss:$8 sps:$4 sm:$0xff]  }
 0x5a0   :  { %v1489_v48 = vpack.c.bf16 %v1475_v44, %v1474_v42  ;;  %v3001_v42 = vld [vmem:[#allocation13 + $0x40] ss:$8 sps:$4 sm:$0xff]   ;;  %v3006_v44 = vld [vmem:[#allocation13 + $0x54] ss:$8 sps:$4 sm:$0xff]  }
 0x5a1   :  { %v1488_v49 = vpack.c.bf16 %v1473_v46, %v1472_v45  ;;  %v3004_v45 = vld [vmem:[#allocation13 + $0x50] ss:$8 sps:$4 sm:$0xff]   ;;  %v3009_v46 = vld [vmem:[#allocation13 + $0x64] ss:$8 sps:$4 sm:$0xff]  }
 0x5a3   :  { %2819 = vmatprep.mubr.bf16.mxu0 %v1488_v49  ;;  %v3012_v49 = vld [vmem:[#allocation13 + $0x74] ss:$8 sps:$4 sm:$0xff]  }
 0x5a4   :  { %2820 = vmatmul.mubr.bf16.vlgmr.msra.gmra.mrb[32].mxu0 %v1489_v48  ;;  %v3007_v48 = vld [vmem:[#allocation13 + $0x60] ss:$8 sps:$4 sm:$0xff]  }
 0x5a5   :  { %v2793_v55 = vpop.f32.mrb[68].mxu1 }
 0x5a6   :  { %v1434_v58 = vadd.f32 %v2793_v55, %v2489_v14  ;;  %v1425_v50 = vpop.f32.mrb[69].mxu1  ;;  %v3010_v55 = vld [vmem:[#allocation13 + $0x70] ss:$8 sps:$4 sm:$0xff]  }
 0x5a7   :  { %v1426_v51 = vadd.f32 %v2489_v14, %v1425_v50  ;;  %v2794_v52 = vpop.f32.mrb[70].mxu1  ;;  %v3013_v50 = vld [vmem:[#allocation13 + $0x80] ss:$8 sps:$4 sm:$0xff]  }
 0x5a8   :  { %v1437_v53 = vadd.f32 %v2794_v52, %v2489_v14  ;;  %v1428_v0 = vpop.f32.mrb[71].mxu1  ;;  %v1478_v54 = vmax.f32 %v1434_v58, 0.0  ;;  %v3015_v58 = vld [vmem:[#allocation13 + $0x84] ss:$8 sps:$4 sm:$0xff]   ;;  %v3016_v52 = vld [vmem:[#allocation13 + $0x90] ss:$8 sps:$4 sm:$0xff]  }
 0x5a9   :  { %v1429_v4 = vadd.f32 %v2489_v14, %v1428_v0  ;;  %v1476_v57 = vmax.f32 %v1426_v51, 0.0  ;;  %v3018_v51 = vld [vmem:[#allocation13 + $0x94] ss:$8 sps:$4 sm:$0xff]   ;;  %v3019_v0 = vld [vmem:[#allocation13 + $0xa0] ss:$8 sps:$4 sm:$0xff]  }
 0x5aa   :  { %v1479_v56 = vmax.f32 %v1437_v53, 0.0  ;;  %v3021_v53 = vld [vmem:[#allocation13 + $0xa4] ss:$8 sps:$4 sm:$0xff]  }
 0x5ab   :  { %v1477_v59 = vmax.f32 %v1429_v4, 0.0  ;;  %v3024_v4 = vld [vmem:[#allocation13 + $0xb4] ss:$8 sps:$4 sm:$0xff]  }
 0x5ac   :  { %v1491_v60 = vpack.c.bf16 %v1479_v56, %v1478_v54  ;;  %v3022_v54 = vld [vmem:[#allocation13 + $0xb0] ss:$8 sps:$4 sm:$0xff]   ;;  %v3027_v56 = vld [vmem:[#allocation13 + $0xc4] ss:$8 sps:$4 sm:$0xff]  }
 0x5ad   :  { %v1490_v61 = vpack.c.bf16 %v1477_v59, %v1476_v57  ;;  %v3025_v57 = vld [vmem:[#allocation13 + $0xc0] ss:$8 sps:$4 sm:$0xff]   ;;  %v3030_v59 = vld [vmem:[#allocation13 + $0xd4] ss:$8 sps:$4 sm:$0xff]  }
 0x5af   :  { %2823 = vmatprep.mubr.bf16.mxu0 %v1490_v61  ;;  %v2500_v61 = vld [vmem:[%s4017_s10 + $0x6] ss:$0 sm:$0xff] }
 0x5b0   :  { %2824 = vmatmul.mubr.bf16.gmra.mrb[36].mxu0 %v1491_v60  ;;  %v3028_v60 = vld [vmem:[#allocation13 + $0xd0] ss:$8 sps:$4 sm:$0xff]  }
 0x5b5   :  { %v2797_v62 = vpop.f32.mrb[72].mxu1 }
 0x5b6   :  { %v1450_v63 = vadd.f32 %v2797_v62, %v2489_v14  ;;  %v1441_v1 = vpop.f32.mrb[73].mxu1 }
 0x5b7   :  { %v1442_v2 = vadd.f32 %v2489_v14, %v1441_v1  ;;  %v2798_v11 = vpop.f32.mrb[74].mxu1 }
 0x5b8   :  { %v1453_v3 = vadd.f32 %v2798_v11, %v2489_v14  ;;  %v1444_v15 = vpop.f32.mrb[75].mxu1  ;;  %v1482_v29 = vmax.f32 %v1450_v63, 0.0 }
 0x5b9   :  { %v1445_v24 = vadd.f32 %v2489_v14, %v1444_v15  ;;  %v1480_v6 = vmax.f32 %v1442_v2, 0.0 }
 0x5ba   :  { %v1483_v5 = vmax.f32 %v1453_v3, 0.0 }
 0x5bb   :  { %v1481_v7 = vmax.f32 %v1445_v24, 0.0 }
 0x5bc   :  { %v1493_v8 = vpack.c.bf16 %v1483_v5, %v1482_v29 }
 0x5bd   :  { %v1492_v18 = vpack.c.bf16 %v1481_v7, %v1480_v6 }
 0x5bf   :  { %2827 = vmatprep.mubr.bf16.mxu0 %v1492_v18 }
 0x5c0   :  { %2828 = vmatmul.mubr.bf16.gmra.mrb[40].mxu0 %v1493_v8 }
 0x5c5   :  { %v2801_v9 = vpop.f32.mrb[76].mxu1 }
 0x5c6   :  { %v1466_v16 = vadd.f32 %v2801_v9, %v2489_v14  ;;  %v1457_v10 = vpop.f32.mrb[77].mxu1 }
 0x5c7   :  { %v1458_v12 = vadd.f32 %v2489_v14, %v1457_v10  ;;  %v2802_v22 = vpop.f32.mrb[78].mxu1 }
 0x5c8   :  { %v1469_v25 = vadd.f32 %v2802_v22, %v2489_v14  ;;  %v1460_v13 = vpop.f32.mrb[79].mxu1  ;;  %v1486_v19 = vmax.f32 %v1466_v16, 0.0 }
 0x5c9   :  { %v1461_v17 = vadd.f32 %v2489_v14, %v1460_v13  ;;  %v1484_v21 = vmax.f32 %v1458_v12, 0.0  ;;  %v2989_v14 = vld [vmem:[#allocation13] ss:$8 sps:$4 sm:$0xff]  }
 0x5ca   :  { %v1487_v20 = vmax.f32 %v1469_v25, 0.0  ;;  %2162 = vmatpush1.bf16.msra.mxu0 %v2989_v14 }
 0x5cb   :  { %v1485_v23 = vmax.f32 %v1461_v17, 0.0  ;;  %2163 = vmatprep.subr.bf16.mxu0 %v2994_v33 }
 0x5cc   :  { %v1495_v26 = vpack.c.bf16 %v1487_v20, %v1486_v19 }
 0x5cd   :  { %v1494_v27 = vpack.c.bf16 %v1485_v23, %v1484_v21 }
 0x5ce   :  { %2164 = vmatpush1.bf16.msra.mxu0 %v2992_v43 }
 0x5cf   :  { %2831 = vmatprep.mubr.bf16.mxu0 %v1494_v27  ;;  %2165 = vmatprep.subr.bf16.mxu0 %v2997_v47 }
 0x5d0   :  { %2832 = vmatmul.mubr.bf16.gmra.mrb[44].mxu0 %v1495_v26 }
 0x5d2   :  { %2166 = vmatpush1.bf16.msra.mxu0 %v2995_v36 }
 0x5d3   :  { %2167 = vmatprep.subr.bf16.mxu0 %v3000_v40 }
 0x5d6   :  { %2168 = vmatpush1.bf16.msra.mxu0 %v2998_v38 }
 0x5d7   :  { %2169 = vmatprep.subr.bf16.mxu0 %v3003_v41 }
 0x5da   :  { %2170 = vmatpush1.bf16.msra.mxu0 %v3001_v42 }
 0x5db   :  { %2171 = vmatprep.subr.bf16.mxu0 %v3006_v44 }
 0x5de   :  { %2172 = vmatpush1.bf16.msra.mxu0 %v3004_v45 }
 0x5df   :  { %2173 = vmatprep.subr.bf16.mxu0 %v3009_v46 }
 0x5e2   :  { %2174 = vmatpush1.bf16.msra.mxu0 %v3007_v48 }
 0x5e3   :  { %2175 = vmatprep.subr.bf16.mxu0 %v3012_v49 }
 0x5e6   :  { %2176 = vmatpush1.bf16.msra.mxu0 %v3010_v55 }
 0x5e7   :  { %2177 = vmatprep.subr.bf16.mxu0 %v3015_v58 }
 0x5ea   :  { %2178 = vmatpush1.bf16.msra.mxu0 %v3013_v50 }
 0x5eb   :  { %2179 = vmatprep.subr.bf16.mxu0 %v3018_v51 }
 0x5ee   :  { %2180 = vmatpush1.bf16.msra.mxu0 %v3016_v52 }
 0x5ef   :  { %2181 = vmatprep.subr.bf16.mxu0 %v3021_v53 }
 0x5f2   :  { %2182 = vmatpush1.bf16.msra.mxu0 %v3019_v0 }
 0x5f3   :  { %2183 = vmatprep.subr.bf16.mxu0 %v3024_v4 }
 0x5f6   :  { %2184 = vmatpush1.bf16.msra.mxu0 %v3022_v54 }
 0x5f7   :  { %2185 = vmatprep.subr.bf16.mxu0 %v3027_v56  ;;  %v3033_v56 = vld [vmem:[#allocation13 + $0xe4] ss:$8 sps:$4 sm:$0xff]  }
 0x5fa   :  { %2186 = vmatpush1.bf16.msra.mxu0 %v3025_v57  ;;  %v3031_v57 = vld [vmem:[#allocation13 + $0xe0] ss:$8 sps:$4 sm:$0xff]  }
 0x5fb   :  { %2187 = vmatprep.subr.bf16.mxu0 %v3030_v59  ;;  %v3036_v59 = vld [vmem:[#allocation13 + $0xf4] ss:$8 sps:$4 sm:$0xff]  }
 0x5fe   :  { %2188 = vmatpush1.bf16.msra.mxu0 %v3028_v60  ;;  %v3034_v60 = vld [vmem:[#allocation13 + $0xf0] ss:$8 sps:$4 sm:$0xff]  }
 0x5ff   :  { %2189 = vmatprep.subr.bf16.mxu0 %v3033_v56 }
 0x602   :  { %2190 = vmatpush1.bf16.msra.mxu0 %v3031_v57 }
 0x603   :  { %2191 = vmatprep.subr.bf16.mxu0 %v3036_v59 }
 0x606   :  { %2192 = vmatpush1.bf16.msra.mxu0 %v3034_v60 }
 0x677   :  { %v2821_v62 = vpop.f32.mrb[32].mxu0 }
 0x678   :  { %v1610_v63 = vadd.f32 %v2821_v62, %v2500_v61  ;;  %v1601_v1 = vpop.f32.mrb[33].mxu0 }
 0x679   :  { %v1602_v2 = vadd.f32 %v2500_v61, %v1601_v1  ;;  %v2822_v11 = vpop.f32.mrb[34].mxu0 }
 0x67a   :  { %v1613_v3 = vadd.f32 %v2822_v11, %v2500_v61  ;;  %v1604_v15 = vpop.f32.mrb[35].mxu0  ;;  %v1666_v29 = vmax.f32 %v1610_v63, 0.0 }
 0x67b   :  { %v1605_v24 = vadd.f32 %v2500_v61, %v1604_v15  ;;  %v1664_v6 = vmax.f32 %v1602_v2, 0.0 }
 0x67c   :  { %v1667_v5 = vmax.f32 %v1613_v3, 0.0 }
 0x67d   :  { %v1665_v7 = vmax.f32 %v1605_v24, 0.0 }
 0x67e   :  { %v1681_v8 = vpack.c.bf16 %v1667_v5, %v1666_v29 }
 0x67f   :  { %v1680_v18 = vpack.c.bf16 %v1665_v7, %v1664_v6 }
 0x681   :  { %1829 = vmatmul.mubr.bf16.vlgmr.msra.gmra.mrb[80].mxu1 %v1680_v18 }
 0x682   :  { %1838 = vmatprep.mubr.bf16.mxu1 %v3269_v31 }
 0x683   :  { %v2825_v9 = vpop.f32.mrb[36].mxu0 }
 0x684   :  { %v1626_v16 = vadd.f32 %v2825_v9, %v2500_v61  ;;  %v1617_v10 = vpop.f32.mrb[37].mxu0 }
 0x685   :  { %v1618_v12 = vadd.f32 %v2500_v61, %v1617_v10  ;;  %v2826_v22 = vpop.f32.mrb[38].mxu0 }
 0x686   :  { %v1629_v25 = vadd.f32 %v2826_v22, %v2500_v61  ;;  %v1620_v13 = vpop.f32.mrb[39].mxu0  ;;  %v1670_v19 = vmax.f32 %v1626_v16, 0.0 }
 0x687   :  { %v1621_v17 = vadd.f32 %v2500_v61, %v1620_v13  ;;  %v1668_v21 = vmax.f32 %v1618_v12, 0.0 }
 0x688   :  { %v1671_v20 = vmax.f32 %v1629_v25, 0.0 }
 0x689   :  { %v1669_v23 = vmax.f32 %v1621_v17, 0.0  ;;  %1839 = vmatmul.mubr.bf16.gmra.mrb[84].mxu1 %v1681_v8 }
 0x68a   :  { %v1683_v26 = vpack.c.bf16 %v1671_v20, %v1670_v19  ;;  %1848 = vmatprep.mubr.bf16.mxu1 %v3269_v31 }
 0x68b   :  { %v1682_v27 = vpack.c.bf16 %v1669_v23, %v1668_v21 }
 0x691   :  { %1849 = vmatmul.mubr.bf16.gmra.mrb[88].mxu1 %v1682_v27 }
 0x692   :  { %1858 = vmatprep.mubr.bf16.mxu1 %v3269_v31 }
 0x693   :  { %v2829_v28 = vpop.f32.mrb[40].mxu0 }
 0x694   :  { %v1642_v30 = vadd.f32 %v2829_v28, %v2500_v61  ;;  %v1633_v39 = vpop.f32.mrb[41].mxu0 }
 0x695   :  { %v1634_v34 = vadd.f32 %v2500_v61, %v1633_v39  ;;  %v2830_v14 = vpop.f32.mrb[42].mxu0 }
 0x696   :  { %v1645_v32 = vadd.f32 %v2830_v14, %v2500_v61  ;;  %v1636_v33 = vpop.f32.mrb[43].mxu0  ;;  %v1674_v47 = vmax.f32 %v1642_v30, 0.0 }
 0x697   :  { %v1637_v43 = vadd.f32 %v2500_v61, %v1636_v33  ;;  %v1672_v40 = vmax.f32 %v1634_v34, 0.0 }
 0x698   :  { %v1675_v36 = vmax.f32 %v1645_v32, 0.0 }
 0x699   :  { %v1673_v38 = vmax.f32 %v1637_v43, 0.0  ;;  %1859 = vmatmul.mubr.bf16.gmra.mrb[92].mxu1 %v1683_v26 }
 0x69a   :  { %v1685_v41 = vpack.c.bf16 %v1675_v36, %v1674_v47  ;;  %1868 = vmatprep.mubr.bf16.mxu1 %v3269_v31 }
 0x69b   :  { %v1684_v42 = vpack.c.bf16 %v1673_v38, %v1672_v40 }
 0x6a1   :  { %1869 = vmatmul.mubr.bf16.gmra.mrb[96].mxu1 %v1684_v42 }
 0x6a2   :  { %1878 = vmatprep.mubr.bf16.mxu1 %v3269_v31 }
 0x6a3   :  { %v2833_v44 = vpop.f32.mrb[44].mxu0 }
 0x6a4   :  { %v1658_v45 = vadd.f32 %v2833_v44, %v2500_v61  ;;  %v1649_v46 = vpop.f32.mrb[45].mxu0 }
 0x6a5   :  { %v1650_v48 = vadd.f32 %v2500_v61, %v1649_v46  ;;  %v2834_v49 = vpop.f32.mrb[46].mxu0 }
 0x6a6   :  { %v1661_v55 = vadd.f32 %v2834_v49, %v2500_v61  ;;  %v1652_v58 = vpop.f32.mrb[47].mxu0  ;;  %v1678_v51 = vmax.f32 %v1658_v45, 0.0 }
 0x6a7   :  { %v1653_v50 = vadd.f32 %v2500_v61, %v1652_v58  ;;  %v1676_v53 = vmax.f32 %v1650_v48, 0.0  ;;  %v1704_v61 = vld [vmem:[%s4017_s10 + $0x7] sm:$0x3] }
 0x6a8   :  { %v1679_v52 = vmax.f32 %v1661_v55, 0.0  ;;  %v3914_v62 = vrot.slane %v1704_v61, %v3488_v35  ;;  %v3917_v63 = vrot.slane %v1704_v61, %v3493_v37 }
 0x6a9   :  { %v1677_v0 = vmax.f32 %v1653_v50, 0.0  ;;  %1879 = vmatmul.mubr.bf16.gmra.mrb[100].mxu1 %v1685_v41 }
 0x6aa   :  { %v1687_v4 = vpack.c.bf16 %v1679_v52, %v1678_v51  ;;  %1888 = vmatprep.mubr.bf16.mxu1 %v3269_v31 }
 0x6ab   :  { %v1686_v54 = vpack.c.bf16 %v1677_v0, %v1676_v53 }
 0x6b1   :  { %1889 = vmatmul.mubr.bf16.gmra.mrb[104].mxu1 %v1686_v54 }
 0x6b2   :  { %1898 = vmatprep.mubr.bf16.mxu1 %v3269_v31 }
 0x6b9   :  { %1899 = vmatmul.mubr.bf16.gmra.mrb[108].mxu1 %v1687_v4 }
 0x754   :  { %v1830_v31 = vpop.f32.mrb[80].mxu1 }
 0x755   :  { %v1831_v1 = vadd.f32 %v1830_v31, %v3914_v62  ;;  %v1832_v2 = vpop.f32.mrb[81].mxu1 }
 0x756   :  { %v1833_v11 = vadd.f32 %v1832_v2, %v3917_v63  ;;  %v1834_v3 = vpop.f32.mrb[82].mxu1 }
 0x757   :  { %v1835_v15 = vadd.f32 %v1834_v3, %v3914_v62  ;;  %v1836_v24 = vpop.f32.mrb[83].mxu1  ;;  %v1909_v5 = vmax.f32 %v1831_v1, 0.0 }
 0x758   :  { %v1837_v29 = vadd.f32 %v1836_v24, %v3917_v63  ;;  %v1910_v7 = vmax.f32 %v1833_v11, 0.0 }
 0x759   :  { %v1911_v6 = vmax.f32 %v1835_v15, 0.0 }
 0x75a   :  { %v1912_v8 = vmax.f32 %v1837_v29, 0.0 }
 0x75b   :  { %v1941_v18 = vpack.c.bf16 %v1911_v6, %v1909_v5 }
 0x75c   :  { %v1942_v9 = vpack.c.bf16 %v1912_v8, %v1910_v7  ;;  %v1840_v16 = vpop.f32.mrb[84].mxu1 }
 0x75d   :  { %v1841_v10 = vadd.f32 %v1840_v16, %v3914_v62  ;;  %v1842_v12 = vpop.f32.mrb[85].mxu1 }
 0x75e   :  { %v1843_v22 = vadd.f32 %v1842_v12, %v3917_v63  ;;  %v1844_v25 = vpop.f32.mrb[86].mxu1  ;;  %2193 = vmatprep.mubr.bf16.mxu0 %v1942_v9 }
 0x75f   :  { %v1845_v13 = vadd.f32 %v1844_v25, %v3914_v62  ;;  %v1846_v17 = vpop.f32.mrb[87].mxu1  ;;  %2194 = vmatmul.mubr.bf16.vlgmr.msra.gmra.mrb[48].mxu0 %v1941_v18  ;;  %v1913_v20 = vmax.f32 %v1841_v10, 0.0 }
 0x760   :  { %v1847_v19 = vadd.f32 %v1846_v17, %v3917_v63  ;;  %v1914_v23 = vmax.f32 %v1843_v22, 0.0 }
 0x761   :  { %v1915_v21 = vmax.f32 %v1845_v13, 0.0 }
 0x762   :  { %v1916_v26 = vmax.f32 %v1847_v19, 0.0 }
 0x763   :  { %v1943_v27 = vpack.c.bf16 %v1915_v21, %v1913_v20 }
 0x764   :  { %v1944_v28 = vpack.c.bf16 %v1916_v26, %v1914_v23  ;;  %v1850_v30 = vpop.f32.mrb[88].mxu1 }
 0x765   :  { %v1851_v39 = vadd.f32 %v1850_v30, %v3914_v62  ;;  %v1852_v34 = vpop.f32.mrb[89].mxu1 }
 0x766   :  { %v1853_v14 = vadd.f32 %v1852_v34, %v3917_v63  ;;  %v1854_v32 = vpop.f32.mrb[90].mxu1  ;;  %2203 = vmatprep.mubr.bf16.mxu0 %v1944_v28 }
 0x767   :  { %v1855_v33 = vadd.f32 %v1854_v32, %v3914_v62  ;;  %v1856_v43 = vpop.f32.mrb[91].mxu1  ;;  %2204 = vmatmul.mubr.bf16.gmra.mrb[52].mxu0 %v1943_v27  ;;  %v1917_v36 = vmax.f32 %v1851_v39, 0.0 }
 0x768   :  { %v1857_v47 = vadd.f32 %v1856_v43, %v3917_v63  ;;  %v1918_v38 = vmax.f32 %v1853_v14, 0.0 }
 0x769   :  { %v1919_v40 = vmax.f32 %v1855_v33, 0.0 }
 0x76a   :  { %v1920_v41 = vmax.f32 %v1857_v47, 0.0 }
 0x76b   :  { %v1945_v42 = vpack.c.bf16 %v1919_v40, %v1917_v36 }
 0x76c   :  { %v1946_v44 = vpack.c.bf16 %v1920_v41, %v1918_v38  ;;  %v1860_v45 = vpop.f32.mrb[92].mxu1 }
 0x76d   :  { %v1861_v46 = vadd.f32 %v1860_v45, %v3914_v62  ;;  %v1862_v48 = vpop.f32.mrb[93].mxu1 }
 0x76e   :  { %v1863_v49 = vadd.f32 %v1862_v48, %v3917_v63  ;;  %v1864_v55 = vpop.f32.mrb[94].mxu1  ;;  %2213 = vmatprep.mubr.bf16.mxu0 %v1946_v44 }
 0x76f   :  { %v1865_v58 = vadd.f32 %v1864_v55, %v3914_v62  ;;  %v1866_v50 = vpop.f32.mrb[95].mxu1  ;;  %2214 = vmatmul.mubr.bf16.gmra.mrb[56].mxu0 %v1945_v42  ;;  %v1921_v52 = vmax.f32 %v1861_v46, 0.0 }
 0x770   :  { %v1867_v51 = vadd.f32 %v1866_v50, %v3917_v63  ;;  %v1922_v0 = vmax.f32 %v1863_v49, 0.0 }
 0x771   :  { %v1923_v53 = vmax.f32 %v1865_v58, 0.0 }
 0x772   :  { %v1924_v4 = vmax.f32 %v1867_v51, 0.0 }
 0x773   :  { %v1947_v54 = vpack.c.bf16 %v1923_v53, %v1921_v52 }
 0x774   :  { %v1948_v56 = vpack.c.bf16 %v1924_v4, %v1922_v0  ;;  %v1870_v57 = vpop.f32.mrb[96].mxu1  ;;  %v1989_v0 = vld [vmem:[%s4017_s10 + $0x9] sm:$0x3]  ;;  %s3270_s10 = smov [#allocation14]  }
 0x775   :  { %v1871_v59 = vadd.f32 %v1870_v57, %v3914_v62  ;;  %v1872_v60 = vpop.f32.mrb[97].mxu1  ;;  %v3955_v4 = vrot.slane %v1989_v0, %v3488_v35  ;;  %s2407_s18 = sshll.u32 %s3270_s10, 4  ;;  %s2408_s18 = int_to_ptr.vmem [resolvable:$true] %s2407_s18 }
 0x776   :  { %v1873_v61 = vadd.f32 %v1872_v60, %v3917_v63  ;;  %v1874_v31 = vpop.f32.mrb[98].mxu1  ;;  %2223 = vmatprep.mubr.bf16.mxu0 %v1948_v56  ;;  %s3223_s19 = scalar_lea.vmem %s2408_s18, 4096  ;;  %p3228_p1 = scmp.lt.s32.totalorder %s2408_s18, %s2408_s18 }
 0x777   :  { %v1875_v1 = vadd.f32 %v1874_v31, %v3914_v62  ;;  %v1876_v2 = vpop.f32.mrb[99].mxu1  ;;  %2224 = vmatmul.mubr.bf16.gmra.mrb[60].mxu0 %v1947_v54  ;;  %v1925_v3 = vmax.f32 %v1871_v59, 0.0  ;;  %p3224_p0 = scmp.ne.s32.totalorder %s2408_s18, %s3223_s19  ;;  %p3229_p2 = scmp.lt.s32.totalorder %s3223_s19, %s3223_s19 }
 0x778   :  { %v1877_v11 = vadd.f32 %v1876_v2, %v3917_v63  ;;  %v1926_v24 = vmax.f32 %v1873_v61, 0.0 }
 0x779   :  { %v1927_v15 = vmax.f32 %v1875_v1, 0.0  ;;  %p3230_p3 = por %p3229_p2, %p3228_p1 }
 0x77a   :  { %v1928_v29 = vmax.f32 %v1877_v11, 0.0 }
 0x77b   :  { %v1949_v5 = vpack.c.bf16 %v1927_v15, %v1925_v3  ;;  %p3231_p4 = pnand %p3230_p3, %p3224_p0 }
 0x77c   :  { %v1950_v6 = vpack.c.bf16 %v1928_v29, %v1926_v24  ;;  %v1880_v7 = vpop.f32.mrb[100].mxu1 }
 0x77d   :  { %v1881_v8 = vadd.f32 %v1880_v7, %v3914_v62  ;;  %v1882_v18 = vpop.f32.mrb[101].mxu1 }
 0x77e   :  { %v1883_v9 = vadd.f32 %v1882_v18, %v3917_v63  ;;  %v1884_v16 = vpop.f32.mrb[102].mxu1  ;;  %2233 = vmatprep.mubr.bf16.mxu0 %v1950_v6 }
 0x77f   :  { %v1885_v10 = vadd.f32 %v1884_v16, %v3914_v62  ;;  %v1886_v12 = vpop.f32.mrb[103].mxu1  ;;  %2234 = vmatmul.mubr.bf16.gmra.mrb[64].mxu0 %v1949_v5  ;;  %v1929_v25 = vmax.f32 %v1881_v8, 0.0 }
 0x780   :  { %v1887_v22 = vadd.f32 %v1886_v12, %v3917_v63  ;;  %v1930_v17 = vmax.f32 %v1883_v9, 0.0 }
 0x781   :  { %v1931_v13 = vmax.f32 %v1885_v10, 0.0 }
 0x782   :  { %v1932_v19 = vmax.f32 %v1887_v22, 0.0 }
 0x783   :  { %v1951_v20 = vpack.c.bf16 %v1931_v13, %v1929_v25 }
 0x784   :  { %v1952_v21 = vpack.c.bf16 %v1932_v19, %v1930_v17  ;;  %v1890_v23 = vpop.f32.mrb[104].mxu1 }
 0x785   :  { %v1891_v26 = vadd.f32 %v1890_v23, %v3914_v62  ;;  %v1892_v27 = vpop.f32.mrb[105].mxu1 }
 0x786   :  { %v1893_v28 = vadd.f32 %v1892_v27, %v3917_v63  ;;  %v1894_v30 = vpop.f32.mrb[106].mxu1  ;;  %2243 = vmatprep.mubr.bf16.mxu0 %v1952_v21 }
 0x787   :  { %v1895_v39 = vadd.f32 %v1894_v30, %v3914_v62  ;;  %v1896_v34 = vpop.f32.mrb[107].mxu1  ;;  %2244 = vmatmul.mubr.bf16.gmra.mrb[68].mxu0 %v1951_v20  ;;  %v1933_v32 = vmax.f32 %v1891_v26, 0.0 }
 0x788   :  { %v1897_v14 = vadd.f32 %v1896_v34, %v3917_v63  ;;  %v1934_v43 = vmax.f32 %v1893_v28, 0.0 }
 0x789   :  { %v1935_v33 = vmax.f32 %v1895_v39, 0.0 }
 0x78a   :  { %v1936_v47 = vmax.f32 %v1897_v14, 0.0 }
 0x78b   :  { %v1953_v36 = vpack.c.bf16 %v1935_v33, %v1933_v32 }
 0x78c   :  { %v1954_v40 = vpack.c.bf16 %v1936_v47, %v1934_v43  ;;  %v1900_v38 = vpop.f32.mrb[108].mxu1 }
 0x78d   :  { %v1901_v41 = vadd.f32 %v1900_v38, %v3914_v62  ;;  %v1902_v42 = vpop.f32.mrb[109].mxu1 }
 0x78e   :  { %v1903_v44 = vadd.f32 %v1902_v42, %v3917_v63  ;;  %v1904_v45 = vpop.f32.mrb[110].mxu1  ;;  %2253 = vmatprep.mubr.bf16.mxu0 %v1954_v40 }
 0x78f   :  { %v1905_v46 = vadd.f32 %v1904_v45, %v3914_v62  ;;  %v1906_v48 = vpop.f32.mrb[111].mxu1  ;;  %2254 = vmatmul.mubr.bf16.gmra.mrb[72].mxu0 %v1953_v36  ;;  %v1937_v55 = vmax.f32 %v1901_v41, 0.0  ;;  %v3958_v62 = vrot.slane %v1989_v0, %v3493_v37 }
 0x790   :  { %v1907_v49 = vadd.f32 %v1906_v48, %v3917_v63  ;;  %v1938_v50 = vmax.f32 %v1903_v44, 0.0 }
 0x791   :  { %v1939_v58 = vmax.f32 %v1905_v46, 0.0 }
 0x792   :  { %v1940_v51 = vmax.f32 %v1907_v49, 0.0 }
 0x793   :  { %v1955_v52 = vpack.c.bf16 %v1939_v58, %v1937_v55 }
 0x794   :  { %v1956_v53 = vpack.c.bf16 %v1940_v51, %v1938_v50 }
 0x796   :  { %2263 = vmatprep.mubr.bf16.mxu0 %v1956_v53 }
 0x797   :  { %2264 = vmatmul.mubr.bf16.gmra.mrb[76].mxu0 %v1955_v52 }
 0x832   :  { %v2195_v54 = vpop.f32.mrb[48].mxu0 }
 0x833   :  { %v2196_v63 = vadd.f32 %v2195_v54, %v3955_v4  ;;  %v2197_v56 = vpop.f32.mrb[49].mxu0 }
 0x834   :  { %v2198_v57 = vadd.f32 %v2197_v56, %v3958_v62  ;;  %v2199_v59 = vpop.f32.mrb[50].mxu0 }
 0x835   :  { %2274 = vst [vmem:[#allocation14] sm:$0xff] %v2196_v63  ;;  %v2200_v60 = vadd.f32 %v2199_v59, %v3955_v4  ;;  %v2201_v61 = vpop.f32.mrb[51].mxu0 }
 0x836   :  { %2275 = vst [vmem:[#allocation14 + $0x8] sm:$0xff] %v2198_v57  ;;  %v2202_v31 = vadd.f32 %v2201_v61, %v3958_v62 }
 0x837   :  { %2276 = vst [vmem:[#allocation14 + $0x10] sm:$0xff] %v2200_v60 }
 0x838   :  { %2277 = vst [vmem:[#allocation14 + $0x18] sm:$0xff] %v2202_v31 }
 0x83a   :  { %v2205_v35 = vpop.f32.mrb[52].mxu0 }
 0x83b   :  { %v2206_v37 = vadd.f32 %v2205_v35, %v3955_v4  ;;  %v2207_v1 = vpop.f32.mrb[53].mxu0 }
 0x83c   :  { %v2208_v2 = vadd.f32 %v2207_v1, %v3958_v62  ;;  %v2209_v11 = vpop.f32.mrb[54].mxu0 }
 0x83d   :  { %2278 = vst [vmem:[#allocation14 + $0x20] sm:$0xff] %v2206_v37  ;;  %v2210_v3 = vadd.f32 %v2209_v11, %v3955_v4  ;;  %v2211_v15 = vpop.f32.mrb[55].mxu0 }
 0x83e   :  { %2279 = vst [vmem:[#allocation14 + $0x28] sm:$0xff] %v2208_v2  ;;  %v2212_v24 = vadd.f32 %v2211_v15, %v3958_v62 }
 0x83f   :  { %2280 = vst [vmem:[#allocation14 + $0x30] sm:$0xff] %v2210_v3 }
 0x840   :  { %2281 = vst [vmem:[#allocation14 + $0x38] sm:$0xff] %v2212_v24 }
 0x842   :  { %v2215_v29 = vpop.f32.mrb[56].mxu0 }
 0x843   :  { %v2216_v5 = vadd.f32 %v2215_v29, %v3955_v4  ;;  %v2217_v6 = vpop.f32.mrb[57].mxu0 }
 0x844   :  { %v2218_v7 = vadd.f32 %v2217_v6, %v3958_v62  ;;  %v2219_v8 = vpop.f32.mrb[58].mxu0 }
 0x845   :  { %2282 = vst [vmem:[#allocation14 + $0x40] sm:$0xff] %v2216_v5  ;;  %v2220_v18 = vadd.f32 %v2219_v8, %v3955_v4  ;;  %v2221_v9 = vpop.f32.mrb[59].mxu0 }
 0x846   :  { %2283 = vst [vmem:[#allocation14 + $0x48] sm:$0xff] %v2218_v7  ;;  %v2222_v16 = vadd.f32 %v2221_v9, %v3958_v62 }
 0x847   :  { %2284 = vst [vmem:[#allocation14 + $0x50] sm:$0xff] %v2220_v18 }
 0x848   :  { %2285 = vst [vmem:[#allocation14 + $0x58] sm:$0xff] %v2222_v16 }
 0x84a   :  { %v2225_v10 = vpop.f32.mrb[60].mxu0 }
 0x84b   :  { %v2226_v12 = vadd.f32 %v2225_v10, %v3955_v4  ;;  %v2227_v22 = vpop.f32.mrb[61].mxu0 }
 0x84c   :  { %v2228_v25 = vadd.f32 %v2227_v22, %v3958_v62  ;;  %v2229_v13 = vpop.f32.mrb[62].mxu0 }
 0x84d   :  { %2286 = vst [vmem:[#allocation14 + $0x60] sm:$0xff] %v2226_v12  ;;  %v2230_v17 = vadd.f32 %v2229_v13, %v3955_v4  ;;  %v2231_v19 = vpop.f32.mrb[63].mxu0 }
 0x84e   :  { %2287 = vst [vmem:[#allocation14 + $0x68] sm:$0xff] %v2228_v25  ;;  %v2232_v20 = vadd.f32 %v2231_v19, %v3958_v62 }
 0x84f   :  { %2288 = vst [vmem:[#allocation14 + $0x70] sm:$0xff] %v2230_v17 }
 0x850   :  { %2289 = vst [vmem:[#allocation14 + $0x78] sm:$0xff] %v2232_v20 }
 0x852   :  { %v2235_v21 = vpop.f32.mrb[64].mxu0 }
 0x853   :  { %v2236_v23 = vadd.f32 %v2235_v21, %v3955_v4  ;;  %v2237_v26 = vpop.f32.mrb[65].mxu0 }
 0x854   :  { %v2238_v27 = vadd.f32 %v2237_v26, %v3958_v62  ;;  %v2239_v28 = vpop.f32.mrb[66].mxu0 }
 0x855   :  { %2290 = vst [vmem:[#allocation14 + $0x80] sm:$0xff] %v2236_v23  ;;  %v2240_v30 = vadd.f32 %v2239_v28, %v3955_v4  ;;  %v2241_v39 = vpop.f32.mrb[67].mxu0 }
 0x856   :  { %2291 = vst [vmem:[#allocation14 + $0x88] sm:$0xff] %v2238_v27  ;;  %v2242_v34 = vadd.f32 %v2241_v39, %v3958_v62 }
 0x857   :  { %2292 = vst [vmem:[#allocation14 + $0x90] sm:$0xff] %v2240_v30 }
 0x858   :  { %2293 = vst [vmem:[#allocation14 + $0x98] sm:$0xff] %v2242_v34 }
 0x85a   :  { %v2245_v14 = vpop.f32.mrb[68].mxu0 }
 0x85b   :  { %v2246_v32 = vadd.f32 %v2245_v14, %v3955_v4  ;;  %v2247_v33 = vpop.f32.mrb[69].mxu0 }
 0x85c   :  { %v2248_v43 = vadd.f32 %v2247_v33, %v3958_v62  ;;  %v2249_v47 = vpop.f32.mrb[70].mxu0 }
 0x85d   :  { %2294 = vst [vmem:[#allocation14 + $0xa0] sm:$0xff] %v2246_v32  ;;  %v2250_v36 = vadd.f32 %v2249_v47, %v3955_v4  ;;  %v2251_v40 = vpop.f32.mrb[71].mxu0 }
 0x85e   :  { %2295 = vst [vmem:[#allocation14 + $0xa8] sm:$0xff] %v2248_v43  ;;  %v2252_v38 = vadd.f32 %v2251_v40, %v3958_v62 }
 0x85f   :  { %2296 = vst [vmem:[#allocation14 + $0xb0] sm:$0xff] %v2250_v36 }
 0x860   :  { %2297 = vst [vmem:[#allocation14 + $0xb8] sm:$0xff] %v2252_v38 }
 0x862   :  { %v2255_v41 = vpop.f32.mrb[72].mxu0 }
 0x863   :  { %v2256_v42 = vadd.f32 %v2255_v41, %v3955_v4  ;;  %v2257_v44 = vpop.f32.mrb[73].mxu0 }
 0x864   :  { %v2258_v45 = vadd.f32 %v2257_v44, %v3958_v62  ;;  %v2259_v46 = vpop.f32.mrb[74].mxu0 }
 0x865   :  { %2298 = vst [vmem:[#allocation14 + $0xc0] sm:$0xff] %v2256_v42  ;;  %v2260_v48 = vadd.f32 %v2259_v46, %v3955_v4  ;;  %v2261_v49 = vpop.f32.mrb[75].mxu0 }
 0x866   :  { %2299 = vst [vmem:[#allocation14 + $0xc8] sm:$0xff] %v2258_v45  ;;  %v2262_v55 = vadd.f32 %v2261_v49, %v3958_v62 }
 0x867   :  { %2300 = vst [vmem:[#allocation14 + $0xd0] sm:$0xff] %v2260_v48 }
 0x868   :  { %2301 = vst [vmem:[#allocation14 + $0xd8] sm:$0xff] %v2262_v55 }
 0x86a   :  { %v2265_v58 = vpop.f32.mrb[76].mxu0 }
 0x86b   :  { %v2266_v50 = vadd.f32 %v2265_v58, %v3955_v4  ;;  %v2267_v51 = vpop.f32.mrb[77].mxu0 }
 0x86c   :  { %v2268_v52 = vadd.f32 %v2267_v51, %v3958_v62  ;;  %v2269_v53 = vpop.f32.mrb[78].mxu0 }
 0x86d   :  { %2302 = vst [vmem:[#allocation14 + $0xe0] sm:$0xff] %v2266_v50  ;;  %v2270_v0 = vadd.f32 %v2269_v53, %v3955_v4  ;;  %v2271_v54 = vpop.f32.mrb[79].mxu0 }
 0x86e   :  { %2303 = vst [vmem:[#allocation14 + $0xe8] sm:$0xff] %v2268_v52  ;;  %v2272_v63 = vadd.f32 %v2271_v54, %v3958_v62 }
 0x86f   :  { %2304 = vst [vmem:[#allocation14 + $0xf0] sm:$0xff] %v2270_v0 }
 0x870   :  { %2305 = vst [vmem:[#allocation14 + $0xf8] sm:$0xff] %v2272_v63 }
 0x871   :  { %3234 = shalt.err (!%p3231_p4)
}
 0x872   :  { %s3235_s29 = scalar_lea.hbm %s4018_s11, 4096 }
 0x873   :  { %p3236_p5 = scmp.ne.s32.totalorder %s4018_s11, %s3235_s29  ;;  %p3239_p6 = scmp.lt.u32.totalorder %s3235_s29, %s4018_s11 }
 0x875   :  { %p3241_p7 = pnand %p3239_p6, %p3236_p5 }
 0x877   :  { %3244 = shalt.err (!%p3241_p7)
}
 0x878   :  { %2413 = dma.vmem_to_hbm [thread:$0]  %s2408_s18, 4096, %s4018_s11, [#allocation4], %s3261_s8, %s3261_s8, %s3262_s25  }
 0x879   :  { %3253 = dma.done.wait [#allocation4], 4096  }
 0x87a   :  { %3254 = vsyncadd [#allocation4], 4294963200 }
 0x87b   :  { %2425 = vsyncpa [#allocation3], 1 }
 0x87c   :  { %2426 = vsyncpa [#allocation6], 1 }
 0x87d   :  { %2427 = vsyncpa [#allocation9], 1 }
 0x87e   :  { %2428 = vsyncpa [#allocation12], 1 }
 0x87f   :  { %2429 = vsyncpa [#allocation4], 1 }

</bundles_post_ra>
